<compile_context>
chip_gen: v6e
topology: v6e:2x2x1
jax: 0.10.0
libtpu: 0.0.40
codegen_flags: <defaults>
</compile_context>

<pallas_src>
import jax
import jax.numpy as jnp
from jax.experimental import pallas as pl
from jax.experimental.pallas import tpu as pltpu


NEG_SLOPE = 0.01


def _leaky_relu(x):
    # mul + max (2 VALU ops) instead of cmp + mul + select.  Runs in whatever
    # dtype x is (bf16 inside the kernel for the wide blocks).
    return jnp.maximum(x, NEG_SLOPE * x)


def mlp_kernel(x_ref,
               w1_ref, b1_ref,
               w2_ref, b2_ref,
               w3_ref, b3_ref,
               w4_ref, b4_ref,
               w5_ref, b5_ref,
               o_ref):
    x = x_ref[...]                                           # (1, TM) bf16, batch on lanes

    # Layer 1: Linear(1, 256).  K == 1 -> VPU broadcast outer product in bf16:
    # (256, 1) * (1, TM) -> (256, TM).  bf16 VALU halves elementwise cycles on
    # v6e/v7x and halves the VMEM footprint of the biggest intermediate.
    h = _leaky_relu(w1_ref[...] * x + b1_ref[...])           # (256, TM) bf16

    # Layer 2: Linear(256, 128) -> MXU, bf16 operands, f32 accumulation.
    h = jnp.dot(w2_ref[...], h, preferred_element_type=jnp.float32)
    h = _leaky_relu(h.astype(jnp.bfloat16) + b2_ref[...])    # (128, TM) bf16

    # Dropout(0.1): identity at inference.

    # Layer 3: Linear(128, 128) -> MXU, bf16 operands, f32 accumulation.
    h = jnp.dot(w3_ref[...], h, preferred_element_type=jnp.float32)
    h = _leaky_relu(h.astype(jnp.bfloat16) + b3_ref[...])    # (128, TM) bf16

    # Layer 4: Linear(128, 64) -> MXU, bf16 operands, f32 accumulation.
    h = jnp.dot(w4_ref[...], h, preferred_element_type=jnp.float32)
    h = _leaky_relu(h.astype(jnp.bfloat16) + b4_ref[...])    # (64, TM) bf16

    # Layer 5: Linear(64, 1).  Output width 1 -> VPU multiply + sublane (XLU)
    # reduction with f32 accumulation.  w5 stored as a (64, 1) f32 column.
    y = jnp.sum(h.astype(jnp.float32) * w5_ref[...], axis=0, keepdims=True)
    y = y + b5_ref[...]                                      # (1, TM) f32
    o_ref[...] = y.astype(o_ref.dtype)                       # lane-dense, unmasked store


def _full_spec(shape):
    # Whole (small) parameter tensor resident in VMEM; index_map is constant,
    # so the block is grid-invariant and never re-fetched across grid steps.
    return pl.BlockSpec(shape, lambda i: (0, 0))


def enhanced_sinusoidal_denoising_forward(x, params, *, tile_m=8192):
    """x: (N, 1) float32.  params: f32, PyTorch-native shapes (see init_params).
    Returns (N, 1) float32."""
    N, fin = x.shape
    assert fin == 1

    # Tile must be a multiple of 128 (lane width).  For small batches shrink
    # the tile, but keep at least two grid steps whenever N >= 256 so both
    # v7x TensorCores get work under dimension_semantics=("parallel",).
    tile_m = max(128, (tile_m // 128) * 128)
    if N <= tile_m:
        if N >= 256:
            half = -(-N // 2)
            tile_m = ((half + 127) // 128) * 128
        else:
            tile_m = 128
    grid_n = pl.cdiv(N, tile_m)
    n_pad = grid_n * tile_m

    # Transposed, lane-dense input: (1, n_pad) bf16 with batch on lanes.
    xt = jnp.zeros((1, n_pad), jnp.float32).at[0, :N].set(x[:, 0])
    xt = xt.astype(jnp.bfloat16)

    (w1, b1, w2, b2, w3, b3, w4, b4, w5, b5) = params
    # bf16 weights/biases for layers 1-4 (VPU + MXU operands); layer-5
    # weight/bias stay f32 for the f32 reduction.
    bf = lambda a: a.astype(jnp.bfloat16)
    kernel_params = (bf(w1), bf(b1), bf(w2), bf(b2), bf(w3), bf(b3),
                     bf(w4), bf(b4), w5.astype(jnp.float32),
                     b5.astype(jnp.float32))

    in_specs = [pl.BlockSpec((1, tile_m), lambda i: (0, i))]     # x (batch on lanes)
    in_specs += [_full_spec(p.shape) for p in kernel_params]
    out_spec = pl.BlockSpec((1, tile_m), lambda i: (0, i))

    # Scheduler hints: real per-row MACs and HBM traffic.
    flops_per_row = 2 * (1 * 256 + 256 * 128 + 128 * 128 + 128 * 64 + 64 * 1)
    param_bytes = sum(int(p.size) * p.dtype.itemsize for p in kernel_params)
    cost = pl.CostEstimate(
        flops=n_pad * flops_per_row,
        transcendentals=0,
        bytes_accessed=2 * n_pad + 4 * n_pad + param_bytes,
    )

    # Right-sized scoped-VMEM request: peak live set is ~two (256,TM)-class
    # blocks (bf16 layer-1 activation + an f32 matmul accumulator) plus params,
    # double-buffered I/O tiles and Mosaic scratch.  Never ask for 64 MiB
    # (the whole physical VMEM on v7x).
    vmem_limit_bytes = int(min(96 << 20, max(32 << 20, tile_m * 2816 + (8 << 20))))

    out_t = pl.pallas_call(
        mlp_kernel,
        out_shape=jax.ShapeDtypeStruct((1, n_pad), jnp.float32),
        grid_spec=pltpu.PrefetchScalarGridSpec(
            num_scalar_prefetch=0,
            grid=(grid_n,),
            in_specs=in_specs,
            out_specs=out_spec,
        ),
        compiler_params=pltpu.CompilerParams(
            dimension_semantics=("parallel",),
            vmem_limit_bytes=vmem_limit_bytes,
        ),
        cost_estimate=cost,
    )(xt, *kernel_params)

    return out_t[0, :N].reshape(N, 1)


def init_params(key):
    """Deterministic synthetic parameters with the module's shapes (f32).

    Layers 1-4: weights stored PyTorch-native (out, in); biases as (out, 1).
    Layer 5: weight stored transposed as (64, 1) so the kernel can use a
    VPU multiply + sublane reduction instead of an MXU pass.
    """
    layer_dims = [(1, 256), (256, 128), (128, 128), (128, 64), (64, 1)]
    params = []
    for idx, (fan_in, fan_out) in enumerate(layer_dims):
        key, kw, kb = jax.random.split(key, 3)
        bound = 1.0 / (fan_in ** 0.5)
        w = jax.random.uniform(kw, (fan_out, fan_in), jnp.float32, -bound, bound)
        b = jax.random.uniform(kb, (fan_out, 1), jnp.float32, -bound, bound)
        if idx == len(layer_dims) - 1:
            w = w.T  # (64, 1) column
        params += [w, b]
    return tuple(params)


def reference_forward(x, params):
    """Pure-JAX reference in (N, features) layout, mirroring the kernel's
    bf16-operand / f32-accumulation mixed precision."""
    (w1, b1, w2, b2, w3, b3, w4, b4, w5t, b5) = params
    bf = lambda a: a.astype(jnp.bfloat16)
    h = _leaky_relu(bf(x) @ bf(w1).T + bf(b1).T)                      # (N,256) bf16
    h = jnp.dot(h, bf(w2).T, preferred_element_type=jnp.float32)
    h = _leaky_relu(h.astype(jnp.bfloat16) + bf(b2).T)                # (N,128) bf16
    h = jnp.dot(h, bf(w3).T, preferred_element_type=jnp.float32)
    h = _leaky_relu(h.astype(jnp.bfloat16) + bf(b3).T)                # (N,128) bf16
    h = jnp.dot(h, bf(w4).T, preferred_element_type=jnp.float32)
    h = _leaky_relu(h.astype(jnp.bfloat16) + bf(b4).T)                # (N,64)  bf16
    return h.astype(jnp.float32) @ w5t + b5.T                         # (N,1)   f32


if __name__ == "__main__":
    key = jax.random.PRNGKey(0)
    k_in, k_par = jax.random.split(key)

    N = 512  # batch of scalar samples, shape (N, 1) like the PyTorch model expects
    x = jax.random.normal(k_in, (N, 1), jnp.float32)
    params = init_params(k_par)

    # Default tile path: shrink logic caps the tile at 256 here -> 2 grid
    # steps, exercising the megacore split even at this small test size.
    out = enhanced_sinusoidal_denoising_forward(x, params)
    out = jax.block_until_ready(out)

    ref = reference_forward(x, params)
    assert out.shape == (N, 1)
    max_err = float(jnp.max(jnp.abs(out - ref)))
    assert jnp.allclose(out, ref, atol=1e-2, rtol=1e-2), max_err

    print("KERNEL_OK")
</pallas_src>

<mosaic_0001>
module attributes {stable_mosaic.version = 11 : i64} {
  func.func @mlp_kernel(%arg0: i32, %arg1: memref<1x256xbf16, #tpu.memory_space<vmem>>, %arg2: memref<256x1xbf16, #tpu.memory_space<vmem>>, %arg3: memref<256x1xbf16, #tpu.memory_space<vmem>>, %arg4: memref<128x256xbf16, #tpu.memory_space<vmem>>, %arg5: memref<128x1xbf16, #tpu.memory_space<vmem>>, %arg6: memref<128x128xbf16, #tpu.memory_space<vmem>>, %arg7: memref<128x1xbf16, #tpu.memory_space<vmem>>, %arg8: memref<64x128xbf16, #tpu.memory_space<vmem>>, %arg9: memref<64x1xbf16, #tpu.memory_space<vmem>>, %arg10: memref<64x1xf32, #tpu.memory_space<vmem>>, %arg11: memref<1x1xf32, #tpu.memory_space<vmem>>, %arg12: memref<1x256xf32, #tpu.memory_space<vmem>>) attributes {dimension_semantics = [#tpu.dimension_semantics<parallel>], iteration_bounds = array<i64: 2>, scalar_prefetch = 0 : i64, scratch_operands = 0 : i64, tpu.core_type = #tpu.core_type<tc>, window_params = [{transform_indices = @transform_0, window_bounds = array<i64: 1, 256>}, {pipeline_mode = #tpu.pipeline_mode<synchronous>, transform_indices = @transform_1, window_bounds = array<i64: 256, 1>}, {pipeline_mode = #tpu.pipeline_mode<synchronous>, transform_indices = @transform_2, window_bounds = array<i64: 256, 1>}, {pipeline_mode = #tpu.pipeline_mode<synchronous>, transform_indices = @transform_3, window_bounds = array<i64: 128, 256>}, {pipeline_mode = #tpu.pipeline_mode<synchronous>, transform_indices = @transform_4, window_bounds = array<i64: 128, 1>}, {pipeline_mode = #tpu.pipeline_mode<synchronous>, transform_indices = @transform_5, window_bounds = array<i64: 128, 128>}, {pipeline_mode = #tpu.pipeline_mode<synchronous>, transform_indices = @transform_6, window_bounds = array<i64: 128, 1>}, {pipeline_mode = #tpu.pipeline_mode<synchronous>, transform_indices = @transform_7, window_bounds = array<i64: 64, 128>}, {pipeline_mode = #tpu.pipeline_mode<synchronous>, transform_indices = @transform_8, window_bounds = array<i64: 64, 1>}, {pipeline_mode = #tpu.pipeline_mode<synchronous>, transform_indices = @transform_9, window_bounds = array<i64: 64, 1>}, {pipeline_mode = #tpu.pipeline_mode<synchronous>, transform_indices = @transform_10, window_bounds = array<i64: 1, 1>}, {transform_indices = @transform_11, window_bounds = array<i64: 1, 256>}]} {
    %c0 = arith.constant 0 : index
    %c0_0 = arith.constant 0 : index
    %0 = vector.load %arg1[%c0, %c0_0] : memref<1x256xbf16, #tpu.memory_space<vmem>>, vector<1x256xbf16>
    %c0_1 = arith.constant 0 : index
    %c0_2 = arith.constant 0 : index
    %1 = vector.load %arg2[%c0_1, %c0_2] : memref<256x1xbf16, #tpu.memory_space<vmem>>, vector<256x1xbf16>
    %2 = vector.broadcast %1 : vector<256x1xbf16> to vector<256x256xbf16>
    %3 = vector.broadcast %0 : vector<1x256xbf16> to vector<256x256xbf16>
    %4 = arith.mulf %2, %3 : vector<256x256xbf16>
    %c0_3 = arith.constant 0 : index
    %c0_4 = arith.constant 0 : index
    %5 = vector.load %arg3[%c0_3, %c0_4] : memref<256x1xbf16, #tpu.memory_space<vmem>>, vector<256x1xbf16>
    %6 = vector.broadcast %5 : vector<256x1xbf16> to vector<256x256xbf16>
    %7 = arith.addf %4, %6 : vector<256x256xbf16>
    %cst = arith.constant 1.000980e-02 : bf16
    %8 = vector.broadcast %cst : bf16 to vector<256x256xbf16>
    %9 = arith.mulf %8, %7 : vector<256x256xbf16>
    %10 = arith.maximumf %7, %9 : vector<256x256xbf16>
    %c0_5 = arith.constant 0 : index
    %c0_6 = arith.constant 0 : index
    %11 = vector.load %arg4[%c0_5, %c0_6] : memref<128x256xbf16, #tpu.memory_space<vmem>>, vector<128x256xbf16>
    %cst_7 = arith.constant dense<0.000000e+00> : vector<128x256xf32>
    %12 = tpu.matmul %11, %10, %cst_7 {dimension_numbers = #tpu.dot_dimension_numbers<[1], [0], [0], [1], [0, 0, 1, 1], [], []>} : vector<128x256xbf16>, vector<256x256xbf16>, vector<128x256xf32> -> vector<128x256xf32>
    %13 = arith.truncf %12 : vector<128x256xf32> to vector<128x256xbf16>
    %c0_8 = arith.constant 0 : index
    %c0_9 = arith.constant 0 : index
    %14 = vector.load %arg5[%c0_8, %c0_9] : memref<128x1xbf16, #tpu.memory_space<vmem>>, vector<128x1xbf16>
    %15 = vector.broadcast %14 : vector<128x1xbf16> to vector<128x256xbf16>
    %16 = arith.addf %13, %15 : vector<128x256xbf16>
    %cst_10 = arith.constant 1.000980e-02 : bf16
    %17 = vector.broadcast %cst_10 : bf16 to vector<128x256xbf16>
    %18 = arith.mulf %17, %16 : vector<128x256xbf16>
    %19 = arith.maximumf %16, %18 : vector<128x256xbf16>
    %c0_11 = arith.constant 0 : index
    %c0_12 = arith.constant 0 : index
    %20 = vector.load %arg6[%c0_11, %c0_12] : memref<128x128xbf16, #tpu.memory_space<vmem>>, vector<128x128xbf16>
    %cst_13 = arith.constant dense<0.000000e+00> : vector<128x256xf32>
    %21 = tpu.matmul %20, %19, %cst_13 {dimension_numbers = #tpu.dot_dimension_numbers<[1], [0], [0], [1], [0, 0, 1, 1], [], []>} : vector<128x128xbf16>, vector<128x256xbf16>, vector<128x256xf32> -> vector<128x256xf32>
    %22 = arith.truncf %21 : vector<128x256xf32> to vector<128x256xbf16>
    %c0_14 = arith.constant 0 : index
    %c0_15 = arith.constant 0 : index
    %23 = vector.load %arg7[%c0_14, %c0_15] : memref<128x1xbf16, #tpu.memory_space<vmem>>, vector<128x1xbf16>
    %24 = vector.broadcast %23 : vector<128x1xbf16> to vector<128x256xbf16>
    %25 = arith.addf %22, %24 : vector<128x256xbf16>
    %cst_16 = arith.constant 1.000980e-02 : bf16
    %26 = vector.broadcast %cst_16 : bf16 to vector<128x256xbf16>
    %27 = arith.mulf %26, %25 : vector<128x256xbf16>
    %28 = arith.maximumf %25, %27 : vector<128x256xbf16>
    %c0_17 = arith.constant 0 : index
    %c0_18 = arith.constant 0 : index
    %29 = vector.load %arg8[%c0_17, %c0_18] : memref<64x128xbf16, #tpu.memory_space<vmem>>, vector<64x128xbf16>
    %cst_19 = arith.constant dense<0.000000e+00> : vector<64x256xf32>
    %30 = tpu.matmul %29, %28, %cst_19 {dimension_numbers = #tpu.dot_dimension_numbers<[1], [0], [0], [1], [0, 0, 1, 1], [], []>} : vector<64x128xbf16>, vector<128x256xbf16>, vector<64x256xf32> -> vector<64x256xf32>
    %31 = arith.truncf %30 : vector<64x256xf32> to vector<64x256xbf16>
    %c0_20 = arith.constant 0 : index
    %c0_21 = arith.constant 0 : index
    %32 = vector.load %arg9[%c0_20, %c0_21] : memref<64x1xbf16, #tpu.memory_space<vmem>>, vector<64x1xbf16>
    %33 = vector.broadcast %32 : vector<64x1xbf16> to vector<64x256xbf16>
    %34 = arith.addf %31, %33 : vector<64x256xbf16>
    %cst_22 = arith.constant 1.000980e-02 : bf16
    %35 = vector.broadcast %cst_22 : bf16 to vector<64x256xbf16>
    %36 = arith.mulf %35, %34 : vector<64x256xbf16>
    %37 = arith.maximumf %34, %36 : vector<64x256xbf16>
    %38 = arith.extf %37 : vector<64x256xbf16> to vector<64x256xf32>
    %c0_23 = arith.constant 0 : index
    %c0_24 = arith.constant 0 : index
    %39 = vector.load %arg10[%c0_23, %c0_24] : memref<64x1xf32, #tpu.memory_space<vmem>>, vector<64x1xf32>
    %40 = vector.broadcast %39 : vector<64x1xf32> to vector<64x256xf32>
    %41 = arith.mulf %38, %40 : vector<64x256xf32>
    %cst_25 = arith.constant dense<0.000000e+00> : vector<256xf32>
    %42 = vector.multi_reduction <add>, %41, %cst_25 [0] : vector<64x256xf32> to vector<256xf32>
    %43 = vector.shape_cast %42 : vector<256xf32> to vector<1x256xf32>
    %c0_26 = arith.constant 0 : index
    %c0_27 = arith.constant 0 : index
    %44 = vector.load %arg11[%c0_26, %c0_27] : memref<1x1xf32, #tpu.memory_space<vmem>>, vector<1x1xf32>
    %45 = vector.broadcast %44 : vector<1x1xf32> to vector<1x256xf32>
    %46 = arith.addf %43, %45 : vector<1x256xf32>
    %c0_28 = arith.constant 0 : index
    %c0_29 = arith.constant 0 : index
    %47 = vector.load %arg12[%c0_28, %c0_29] : memref<1x256xf32, #tpu.memory_space<vmem>>, vector<1x256xf32>
    tpu.vector_store %arg12[%c0_28, %c0_29], %46 {strides = array<i32>} : memref<1x256xf32, #tpu.memory_space<vmem>>, vector<1x256xf32>,
    return
  }
  func.func @transform_0(%arg0: i32) -> (i32, i32) {
    %c0_i32 = arith.constant 0 : i32
    %c0_i32_0 = arith.constant 0 : i32
    return %c0_i32, %arg0 : i32, i32
  }
  func.func @transform_1(%arg0: i32) -> (i32, i32) {
    %c0_i32 = arith.constant 0 : i32
    %c0_i32_0 = arith.constant 0 : i32
    %c0_i32_1 = arith.constant 0 : i32
    return %c0_i32, %c0_i32_0 : i32, i32
  }
  func.func @transform_2(%arg0: i32) -> (i32, i32) {
    %c0_i32 = arith.constant 0 : i32
    %c0_i32_0 = arith.constant 0 : i32
    %c0_i32_1 = arith.constant 0 : i32
    return %c0_i32, %c0_i32_0 : i32, i32
  }
  func.func @transform_3(%arg0: i32) -> (i32, i32) {
    %c0_i32 = arith.constant 0 : i32
    %c0_i32_0 = arith.constant 0 : i32
    %c0_i32_1 = arith.constant 0 : i32
    return %c0_i32, %c0_i32_0 : i32, i32
  }
  func.func @transform_4(%arg0: i32) -> (i32, i32) {
    %c0_i32 = arith.constant 0 : i32
    %c0_i32_0 = arith.constant 0 : i32
    %c0_i32_1 = arith.constant 0 : i32
    return %c0_i32, %c0_i32_0 : i32, i32
  }
  func.func @transform_5(%arg0: i32) -> (i32, i32) {
    %c0_i32 = arith.constant 0 : i32
    %c0_i32_0 = arith.constant 0 : i32
    %c0_i32_1 = arith.constant 0 : i32
    return %c0_i32, %c0_i32_0 : i32, i32
  }
  func.func @transform_6(%arg0: i32) -> (i32, i32) {
    %c0_i32 = arith.constant 0 : i32
    %c0_i32_0 = arith.constant 0 : i32
    %c0_i32_1 = arith.constant 0 : i32
    return %c0_i32, %c0_i32_0 : i32, i32
  }
  func.func @transform_7(%arg0: i32) -> (i32, i32) {
    %c0_i32 = arith.constant 0 : i32
    %c0_i32_0 = arith.constant 0 : i32
    %c0_i32_1 = arith.constant 0 : i32
    return %c0_i32, %c0_i32_0 : i32, i32
  }
  func.func @transform_8(%arg0: i32) -> (i32, i32) {
    %c0_i32 = arith.constant 0 : i32
    %c0_i32_0 = arith.constant 0 : i32
    %c0_i32_1 = arith.constant 0 : i32
    return %c0_i32, %c0_i32_0 : i32, i32
  }
  func.func @transform_9(%arg0: i32) -> (i32, i32) {
    %c0_i32 = arith.constant 0 : i32
    %c0_i32_0 = arith.constant 0 : i32
    %c0_i32_1 = arith.constant 0 : i32
    return %c0_i32, %c0_i32_0 : i32, i32
  }
  func.func @transform_10(%arg0: i32) -> (i32, i32) {
    %c0_i32 = arith.constant 0 : i32
    %c0_i32_0 = arith.constant 0 : i32
    %c0_i32_1 = arith.constant 0 : i32
    return %c0_i32, %c0_i32_0 : i32, i32
  }
  func.func @transform_11(%arg0: i32) -> (i32, i32) {
    %c0_i32 = arith.constant 0 : i32
    %c0_i32_0 = arith.constant 0 : i32
    return %c0_i32, %arg0 : i32, i32
  }
}

</mosaic_0001>

<bundles_post_ra>
// kernel: tpu_custom_call.1
= control target key start
LH: loop header
LB: loop body
LE: loop exit
PB: predicated region body
PF: predicated region fallthrough
CT: control target
= control target key end

     0   :  { %s4170_s0 = inlined_call_operand.vmem [shape: bf16[1,512], index: 0, kind: input, shape index: {}]   ;;  %s4171_s1 = inlined_call_operand.vmem [shape: bf16[256,1], index: 1, kind: input, shape index: {}]   ;;  %s4172_s2 = inlined_call_operand.vmem [shape: bf16[256,1], index: 2, kind: input, shape index: {}]   ;;  %s4173_s3 = inlined_call_operand.vmem [shape: bf16[128,256], index: 3, kind: input, shape index: {}]   ;;  %s4174_s4 = inlined_call_operand.vmem [shape: bf16[128,1], index: 4, kind: input, shape index: {}]   ;;  %s4175_s5 = inlined_call_operand.vmem [shape: bf16[128,128], index: 5, kind: input, shape index: {}]   ;;  %s4176_s6 = inlined_call_operand.vmem [shape: bf16[128,1], index: 6, kind: input, shape index: {}]   ;;  %s4177_s7 = inlined_call_operand.vmem [shape: bf16[64,128], index: 7, kind: input, shape index: {}]   ;;  %s4178_s8 = inlined_call_operand.vmem [shape: bf16[64,1], index: 8, kind: input, shape index: {}]   ;;  %s4179_s9 = inlined_call_operand.vmem [shape: f32[64,1], index: 9, kind: input, shape index: {}]   ;;  %s4180_s10 = inlined_call_operand.<no memory space> [shape: f32[1,1], index: 10, kind: input, shape index: {}]   ;;  %s4181_s11 = inlined_call_operand.hbm [shape: f32[1,512], index: 11, kind: output, shape index: {}]  }
   0x1   :  { %4182 = sst [smem:[#allocation6_spill]] %s4170_s0  ;;  %v16_v0 = vstv %s4180_s10 }
   0x2   :  { %17 = vst [vmem:[#allocation2] sm:$0x1] %v16_v0 }
   0x3   :  { %18 = vsyncpa [#allocation4], 0 }
   0x4   :  { %20 = vsyncpa [#allocation4 + $0x1], 0  ;;  %s3359_s19 = smov 0   ;;  %s3361_s20 = smov 0  }
   0x5   :  { %s3363_s21 = smov 0   ;;  %s3365_s22 = smov 0  }
   0x6 LB: > { %s3380_s10 = sadd.s32 4294967295, %s3290_s22   ;;  %s3056_s23 = sadd.s32 4294967294, %s3290_s22   ;;  %s3290_s22 = sphi %s3365_s22, %s4189_s22   ;;  %s3286_s21 = sphi %s3363_s21, %s4188_s21   ;;  %s3282_s20 = sphi %s3361_s20, %s4187_s20   ;;  %s3278_s19 = sphi %s3359_s19, %s4186_s19  }
   0x7   : > { %s3384_s24 = sadd.s32 1, %s3290_s22   ;;  %s269_s25 = sadd.s32 1, %s3286_s21 }
   0x8   : > { %s266_s26 = ssub.s32 %s3290_s22, %s3384_s24  ;;  %p279_p0 = scmp.ne.s32.totalorder %s3286_s21, %s3282_s20 }
   0x9   : > { %p267_p1 = scmp.eq.s32.totalorder %s266_s26, 0  ;;  %p280_p2 = scmp.eq.s32.totalorder %s3380_s10, 1 }
   0xa   : > { %p285_p3 = scmp.ne.s32.totalorder %s3282_s20, %s3278_s19  ;;  %p286_p4 = scmp.eq.s32.totalorder %s3056_s23, 1 }
   0xb   : > { %s3395_s27 = scalar_select %p267_p1, %s3286_s21, %s269_s25  }
   0xc   : > { %p3397_p5 = por %p280_p2, %p279_p0  ;;  %p3401_p6 = por %p286_p4, %p285_p3 }
   0xd   : > { %p3059_p7 = scmp.ge.s32.totalorder %s3290_s22, 1  ;;  %p342_p8 = scmp.lt.s32.totalorder %s3290_s22, 3 }
   0xf   : > { %p343_p9 = pnand %p3059_p7, %p342_p8 }
  0x10   : > { %s3061_s23 = sshll.u32 (!%p343_p9), %s3380_s10, 1  ;;  %s4185_s0 = sld [smem:[#allocation6_spill]] (!%p343_p9) }
  0x11   : > { %346 = sbr.rel (%p343_p9) target bundleno = 1148 (0x47c), region = 64  ;;  %p382_p10 = scmp.lt.s32.totalorder (!%p343_p9), %s3061_s23, 3 }
  0x12   : > { %s378_s26 = sand.u32 (!%p343_p9), 1, %s3282_s20   ;;  %s3149_s12 = sshll.u32 (!%p343_p9), %s3380_s10, 5 }
  0x13   : > { %s3060_s30 = sshll.u32 (!%p343_p9), %s378_s26, 1  ;;  %s2986_s17 = scalar_lea.sflag (!%p343_p9), [#allocation4], %s378_s26 }
  0x14   : > { %s380_s13 = scalar_lea.vmem (!%p343_p9), [#allocation3], %s3060_s30  ;;  %s3295_s10 = smov (!%p343_p9), [#allocation3]  }
  0x15   : > { %s3000_s14 = sshll.u32 (!%p343_p9), %s380_s13, 4  ;;  %s3001_s14 = int_to_ptr.vmem [resolvable:$true] %s3000_s14 }
  0x16   : > { %v895_v1 = vld [vmem:[%s4172_s2 + $0x38] sm:$0xf]  ;;  %v3292_v3 = vmov 0   ;;  %v896_v4 = vld [vmem:[%s4172_s2 + $0x3c] sm:$0xf]  ;;  %s4191_s23 = smov (!%p382_p10, %s3061_s23), 3  ;;  %v430_v54 = vlaneseq }
  0x17   : > { %v404_v2 = vld [vmem:[%s4171_s1 + $0x38] sm:$0xf]  ;;  %3193 = vset.pattern.permute.xlu1 %v3292_v3  ;;  %3192 = vset.pattern.permute.xlu0 %v3292_v3  ;;  %v405_v5 = vld [vmem:[%s4171_s1 + $0x3c] sm:$0xf]  ;;  %v403_v6 = vld [vmem:[%s4171_s1 + $0x34] sm:$0xf]  ;;  %s384_s25 = scalar_lea.vmem %s4185_s0, %s4191_s23  ;;  %s2998_s23 = scalar_lea.hbm %s4181_s11, %s3149_s12 }
  0x18   : > { %1083 = vperm.xlu1 %3193, %v895_v1   ;;  %592 = vperm.xlu0 %3192, %v404_v2   ;;  %v402_v7 = vld [vmem:[%s4171_s1 + $0x30] sm:$0xf]  ;;  %v894_v8 = vld [vmem:[%s4172_s2 + $0x34] sm:$0xf]  ;;  %v401_v10 = vld [vmem:[%s4171_s1 + $0x2c] sm:$0xf] }
  0x19   : > { %2178 = vmatprep.mubr.bf16.mxu1 %v3292_v3  ;;  %v893_v9 = vld [vmem:[%s4172_s2 + $0x30] sm:$0xf]  ;;  %v400_v11 = vld [vmem:[%s4171_s1 + $0x28] sm:$0xf]  ;;  %v892_v12 = vld [vmem:[%s4172_s2 + $0x2c] sm:$0xf] }
  0x1a   : > { %v891_v13 = vld [vmem:[%s4172_s2 + $0x28] sm:$0xf]  ;;  %v399_v14 = vld [vmem:[%s4171_s1 + $0x24] sm:$0xf]  ;;  %v398_v15 = vld [vmem:[%s4171_s1 + $0x20] sm:$0xf] }
  0x1b   : > { %v890_v16 = vld [vmem:[%s4172_s2 + $0x24] sm:$0xf]  ;;  %v889_v17 = vld [vmem:[%s4172_s2 + $0x20] sm:$0xf]  ;;  %v397_v18 = vld [vmem:[%s4171_s1 + $0x1c] sm:$0xf] }
  0x1c   : > { %1095 = vperm.xlu1 %3193, %v896_v4   ;;  %604 = vperm.xlu0 %3192, %v405_v5   ;;  %v396_v19 = vld [vmem:[%s4171_s1 + $0x18] sm:$0xf]  ;;  %v888_v20 = vld [vmem:[%s4172_s2 + $0x1c] sm:$0xf]  ;;  %v395_v22 = vld [vmem:[%s4171_s1 + $0x14] sm:$0xf] }
  0x1d   : > { %v887_v21 = vld [vmem:[%s4172_s2 + $0x18] sm:$0xf]  ;;  %v394_v23 = vld [vmem:[%s4171_s1 + $0x10] sm:$0xf]  ;;  %v886_v24 = vld [vmem:[%s4172_s2 + $0x14] sm:$0xf] }
  0x1e   : > { %v885_v25 = vld [vmem:[%s4172_s2 + $0x10] sm:$0xf]  ;;  %v393_v26 = vld [vmem:[%s4171_s1 + $0xc] sm:$0xf]  ;;  %v392_v27 = vld [vmem:[%s4171_s1 + $0x8] sm:$0xf] }
  0x1f   : > { %v884_v28 = vld [vmem:[%s4172_s2 + $0xc] sm:$0xf]  ;;  %v883_v29 = vld [vmem:[%s4172_s2 + $0x8] sm:$0xf]  ;;  %v391_v30 = vld [vmem:[%s4171_s1 + $0x4] sm:$0xf] }
  0x20   : > { %580 = vperm.xlu1 %3193, %v403_v6   ;;  %568 = vperm.xlu0 %3192, %v402_v7   ;;  %v390_v31 = vld [vmem:[%s4171_s1] sm:$0xf]  ;;  %v882_v32 = vld [vmem:[%s4172_s2 + $0x4] sm:$0xf]  ;;  %v421_v34 = vld [vmem:[%s4171_s1 + $0x7c] sm:$0xf] }
  0x21   : > { %v881_v33 = vld [vmem:[%s4172_s2] sm:$0xf]  ;;  %v420_v35 = vld [vmem:[%s4171_s1 + $0x78] sm:$0xf]  ;;  %v912_v36 = vld [vmem:[%s4172_s2 + $0x7c] sm:$0xf] }
  0x22   : > { %v911_v37 = vld [vmem:[%s4172_s2 + $0x78] sm:$0xf]  ;;  %v419_v38 = vld [vmem:[%s4171_s1 + $0x74] sm:$0xf]  ;;  %v418_v39 = vld [vmem:[%s4171_s1 + $0x70] sm:$0xf] }
  0x23   : > { %v910_v40 = vld [vmem:[%s4172_s2 + $0x74] sm:$0xf]  ;;  %v909_v41 = vld [vmem:[%s4172_s2 + $0x70] sm:$0xf]  ;;  %v417_v42 = vld [vmem:[%s4171_s1 + $0x6c] sm:$0xf] }
  0x24   : > { %1071 = vperm.xlu1 %3193, %v894_v8   ;;  %1059 = vperm.xlu0 %3192, %v893_v9   ;;  %v416_v43 = vld [vmem:[%s4171_s1 + $0x68] sm:$0xf]  ;;  %v908_v44 = vld [vmem:[%s4172_s2 + $0x6c] sm:$0xf]  ;;  %v415_v46 = vld [vmem:[%s4171_s1 + $0x64] sm:$0xf] }
  0x25   : > { %v907_v45 = vld [vmem:[%s4172_s2 + $0x68] sm:$0xf]  ;;  %v414_v47 = vld [vmem:[%s4171_s1 + $0x60] sm:$0xf]  ;;  %v906_v48 = vld [vmem:[%s4172_s2 + $0x64] sm:$0xf] }
  0x26   : > { %v905_v49 = vld [vmem:[%s4172_s2 + $0x60] sm:$0xf]  ;;  %v413_v50 = vld [vmem:[%s4171_s1 + $0x5c] sm:$0xf]  ;;  %v412_v51 = vld [vmem:[%s4171_s1 + $0x58] sm:$0xf] }
  0x27   : > { %v904_v52 = vld [vmem:[%s4172_s2 + $0x5c] sm:$0xf]  ;;  %v903_v53 = vld [vmem:[%s4172_s2 + $0x58] sm:$0xf]  ;;  %v3293_v55 = vmov 1966171168  }
  0x28   : > { %556 = vperm.xlu1 %3193, %v401_v10   ;;  %544 = vperm.xlu0 %3192, %v400_v11   ;;  %v816_v56 = vunpack.c.l.s4 %v3293_v55  ;;  %v411_v57 = vld [vmem:[%s4171_s1 + $0x54] sm:$0xf]  ;;  %v410_v58 = vld [vmem:[%s4171_s1 + $0x50] sm:$0xf]  ;;  %v431_v59 = vshrl.u32 %v430_v54, 7  ;;  %vm2982_vm0 = vcmp.lt.s32.totalorder %v430_v54, 256 }
  0x29   : > { %v3062_v61 = vld.sshfl [vmem:[%s384_s25] sm:$0x11 pattern:$0x75316420]  ;;  %v902_v62 = vld [vmem:[%s4172_s2 + $0x54] sm:$0xf] }
  0x2a   : > { %v817_v60 = vunpack.c.0.s8 %v816_v56  ;;  %v901_v63 = vld [vmem:[%s4172_s2 + $0x50] sm:$0xf]  ;;  %v814_v1 = vcombine.high %v3062_v61, %v3062_v61  ;;  %v409_v2 = vld [vmem:[%s4171_s1 + $0x4c] sm:$0xf]  ;;  %v408_v4 = vld [vmem:[%s4171_s1 + $0x48] sm:$0xf] }
  0x2b   : > { %v3294_v7 = vmov 839922192   ;;  %v900_v9 = vld [vmem:[%s4172_s2 + $0x4c] sm:$0xf]  ;;  %v899_v10 = vld [vmem:[%s4172_s2 + $0x48] sm:$0xf] }
  0x2c   : > { %1047 = vperm.xlu1 %3193, %v892_v12   ;;  %1035 = vperm.xlu0 %3192, %v891_v13   ;;  %v3583_v0 = vsub.s32 %v817_v60, %v431_v59  ;;  %v428_v8 = vunpack.c.l.s4 %v3294_v7  ;;  %v3599_v11 = vsub.s32 0, %v431_v59  ;;  %v1785_v7 = vld [vmem:[%s4174_s4 + $0x1c] sm:$0xf]  ;;  %s3230_s18 = scalar_lea.vmem %s3001_s14, 32  ;;  %s3234_s25 = sshll.u32 %s3295_s10, 4  ;;  %s3235_s25 = int_to_ptr.vmem [resolvable:$false] %s3234_s25 }
  0x2d   : > { %p3231_p11 = scmp.ne.s32.totalorder %s3001_s14, %s3230_s18  ;;  %s3236_s30 = scalar_lea.vmem %s3235_s25, 64 }
  0x2e   : > { %v821_v5 = vrot.slane %v3062_v61, %v3583_v0  ;;  %v828_v6 = vrot.slane %v814_v1, %v3583_v0  ;;  %p3237_p0 = scmp.lt.s32.totalorder %s3001_s14, %s3235_s25  ;;  %p3238_p1 = scmp.lt.s32.totalorder %s3236_s30, %s3230_s18 }
  0x2f   : > { %p3232_p12 = pnand %p3231_p11, %p3397_p5 }
  0x30   : > { %532 = vperm.xlu1 %3193, %v399_v14   ;;  %520 = vperm.xlu0 %3192, %v398_v15   ;;  %v830_v12 = vpack.i.b16 %v821_v5, %v821_v5  ;;  %v837_v13 = vpack.i.b16 %v828_v6, %v828_v6  ;;  %v429_v14 = vunpack.c.0.s8 %v428_v8  ;;  %v407_v15 = vld [vmem:[%s4171_s1 + $0x44] sm:$0xf]  ;;  %v1784_v8 = vld [vmem:[%s4174_s4 + $0x18] sm:$0xf]  ;;  %p3239_p2 = por %p3238_p1, %p3237_p0 }
  0x31   : > { %p3233_p13 = pneg %p3232_p12 }
  0x33   : > { %p3240_p3 = pnand %p3239_p2, %p3233_p13 }
  0x34   : > { %1023 = vperm.xlu1 %3193, %v890_v16   ;;  %1011 = vperm.xlu0 %3192, %v889_v17   ;;  %v406_v16 = vld [vmem:[%s4171_s1 + $0x40] sm:$0xf]  ;;  %v835_v17 = vrot.slane %v830_v12, %v3599_v11 }
  0x38   : > { %508 = vperm.xlu1 %3193, %v397_v18   ;;  %496 = vperm.xlu0 %3192, %v396_v19   ;;  %v842_v18 = vrot.slane %v837_v13, %v3599_v11  ;;  %v3609_v19 = vsub.s32 %v429_v14, %v431_v59 }
  0x3c   : > { %999 = vperm.xlu1 %3193, %v888_v20   ;;  %987 = vperm.xlu0 %3192, %v887_v21   ;;  %v898_v20 = vld [vmem:[%s4172_s2 + $0x44] sm:$0xf]  ;;  %v897_v21 = vld [vmem:[%s4172_s2 + $0x40] sm:$0xf] }
  0x40   : > { %484 = vperm.xlu1 %3193, %v395_v22   ;;  %472 = vperm.xlu0 %3192, %v394_v23   ;;  %v3617_v22 = vcombine.low %v835_v17, %v842_v18 }
  0x44   : > { %975 = vperm.xlu1 %3193, %v886_v24   ;;  %963 = vperm.xlu0 %3192, %v885_v25  }
  0x48   : > { %460 = vperm.xlu1 %3193, %v393_v26   ;;  %448 = vperm.xlu0 %3192, %v392_v27   ;;  %v1793_v26 = vld [vmem:[%s4174_s4 + $0x3c] sm:$0xf]  ;;  %v1792_v27 = vld [vmem:[%s4174_s4 + $0x38] sm:$0xf] }
  0x4c   : > { %951 = vperm.xlu1 %3193, %v884_v28   ;;  %939 = vperm.xlu0 %3192, %v883_v29  }
  0x50   : > { %436 = vperm.xlu1 %3193, %v391_v30   ;;  %424 = vperm.xlu0 %3192, %v390_v31  }
  0x54   : > { %927 = vperm.xlu1 %3193, %v882_v32   ;;  %915 = vperm.xlu0 %3192, %v881_v33  }
  0x58   : > { %796 = vperm.xlu1 %3193, %v421_v34   ;;  %784 = vperm.xlu0 %3192, %v420_v35   ;;  %v1791_v34 = vld [vmem:[%s4174_s4 + $0x34] sm:$0xf]  ;;  %v1790_v35 = vld [vmem:[%s4174_s4 + $0x30] sm:$0xf] }
  0x5c   : > { %1287 = vperm.xlu1 %3193, %v912_v36   ;;  %1275 = vperm.xlu0 %3192, %v911_v37  }
  0x60   : > { %772 = vperm.xlu1 %3193, %v419_v38   ;;  %760 = vperm.xlu0 %3192, %v418_v39  }
  0x64   : > { %1263 = vperm.xlu1 %3193, %v910_v40   ;;  %1251 = vperm.xlu0 %3192, %v909_v41  }
  0x68   : > { %748 = vperm.xlu1 %3193, %v417_v42   ;;  %736 = vperm.xlu0 %3192, %v416_v43  }
  0x6c   : > { %1239 = vperm.xlu1 %3193, %v908_v44   ;;  %1227 = vperm.xlu0 %3192, %v907_v45   ;;  %v3196_v44 = vld [vmem:[%s4173_s3 + $0x4] ss:$8 sps:$4 sm:$0xff]  }
  0x6d   : > { %v1789_v45 = vld [vmem:[%s4174_s4 + $0x2c] sm:$0xf]  ;;  %1681 = vmatprep.mubr.bf16.mxu0 %v3196_v44  ;;  %v1779_v44 = vld [vmem:[%s4174_s4 + $0x4] sm:$0xf] }
  0x70   : > { %724 = vperm.xlu1 %3193, %v415_v46   ;;  %712 = vperm.xlu0 %3192, %v414_v47   ;;  %v1788_v46 = vld [vmem:[%s4174_s4 + $0x28] sm:$0xf] }
  0x74   : > { %1215 = vperm.xlu1 %3193, %v906_v48   ;;  %1203 = vperm.xlu0 %3192, %v905_v49  }
  0x78   : > { %700 = vperm.xlu1 %3193, %v413_v50   ;;  %688 = vperm.xlu0 %3192, %v412_v51  }
  0x7c   : > { %1191 = vperm.xlu1 %3193, %v904_v52   ;;  %1179 = vperm.xlu0 %3192, %v903_v53  }
  0x80   : > { %676 = vperm.xlu1 %3193, %v411_v57   ;;  %664 = vperm.xlu0 %3192, %v410_v58   ;;  %v1787_v57 = vld [vmem:[%s4174_s4 + $0x24] sm:$0xf]  ;;  %v1786_v58 = vld [vmem:[%s4174_s4 + $0x20] sm:$0xf] }
  0x84   : > { %1167 = vperm.xlu1 %3193, %v902_v62   ;;  %1155 = vperm.xlu0 %3192, %v901_v63  }
  0x88   : > { %652 = vperm.xlu1 %3193, %v409_v2   ;;  %640 = vperm.xlu0 %3192, %v408_v4  }
  0x8c   : > { %1143 = vperm.xlu1 %3193, %v900_v9   ;;  %1131 = vperm.xlu0 %3192, %v899_v10  }
  0x90   : > { %628 = vperm.xlu1 %3193, %v407_v15   ;;  %616 = vperm.xlu0 %3192, %v406_v16  }
  0x93   : > { %v1084_v23 = vpop.permute.xlu1 %1083  ;;  %v593_v24 = vpop.permute.xlu0 %592 }
  0x94   : > { %v601_v25 = vrot.slane %v593_v24, %v3609_v19  ;;  %1119 = vperm.xlu1 %3193, %v898_v20   ;;  %1107 = vperm.xlu0 %3192, %v897_v21   ;;  %v1092_v28 = vrot.slane %v1084_v23, %v3609_v19  ;;  %v1783_v21 = vld [vmem:[%s4174_s4 + $0x14] sm:$0xf]  ;;  %v1782_v23 = vld [vmem:[%s4174_s4 + $0x10] sm:$0xf] }
  0x96   : > { %v863_v29 = vmul.bf16 %v3617_v22, %v601_v25 }
  0x97   : > { %v1096_v30 = vpop.permute.xlu1 %1095  ;;  %v605_v31 = vpop.permute.xlu0 %604 }
  0x98   : > { %v613_v32 = vrot.slane %v605_v31, %v3609_v19  ;;  %1976 = vperm.xlu1 %3193, %v1793_v26   ;;  %1964 = vperm.xlu0 %3192, %v1792_v27   ;;  %v1311_v33 = vadd.bf16 %v1092_v28, %v863_v29  ;;  %v1104_v36 = vrot.slane %v1096_v30, %v3609_v19 }
  0x9a   : > { %v864_v37 = vmul.bf16 %v3617_v22, %v613_v32  ;;  %v1343_v40 = vmul.bf16 1009007652, %v1311_v33  ;;  %v1781_v32 = vld [vmem:[%s4174_s4 + $0xc] sm:$0xf] }
  0x9b   : > { %v581_v38 = vpop.permute.xlu1 %580  ;;  %v569_v39 = vpop.permute.xlu0 %568 }
  0x9c   : > { %v589_v41 = vrot.slane %v581_v38, %v3609_v19  ;;  %v577_v42 = vrot.slane %v569_v39, %v3609_v19  ;;  %1952 = vperm.xlu1 %3193, %v1791_v34   ;;  %1940 = vperm.xlu0 %3192, %v1790_v35   ;;  %v1312_v43 = vadd.bf16 %v1104_v36, %v864_v37 }
  0x9d   : > { %v1375_v52 = vmax.bf16 %v1343_v40, %v1311_v33  ;;  %v1780_v33 = vld [vmem:[%s4174_s4 + $0x8] sm:$0xf] }
  0x9e   : > { %v1344_v47 = vmul.bf16 1009007652, %v1312_v43  ;;  %v862_v48 = vmul.bf16 %v3617_v22, %v589_v41  ;;  %v861_v49 = vmul.bf16 %v3617_v22, %v577_v42 }
  0x9f   : > { %v1072_v50 = vpop.permute.xlu1 %1071  ;;  %v1060_v51 = vpop.permute.xlu0 %1059 }
  0xa0   : > { %v1080_v53 = vrot.slane %v1072_v50, %v3609_v19  ;;  %v1068_v55 = vrot.slane %v1060_v51, %v3609_v19  ;;  %1928 = vperm.xlu1 %3193, %v1789_v45   ;;  %1916 = vperm.xlu0 %3192, %v1788_v46   ;;  %v1376_v56 = vmax.bf16 %v1344_v47, %v1312_v43  ;;  %v1778_v45 = vld [vmem:[%s4174_s4] sm:$0xf] }
  0xa2   : > { %v1310_v59 = vadd.bf16 %v1080_v53, %v862_v48  ;;  %v1309_v60 = vadd.bf16 %v1068_v55, %v861_v49  ;;  %v3095_v61 = vcombine.high %v1375_v52, %v1376_v56  ;;  %v3094_v62 = vcombine.low %v1375_v52, %v1376_v56  ;;  %v2290_v55 = vld [vmem:[%s4176_s6 + $0x3c] sm:$0xf]  ;;  %v2289_v56 = vld [vmem:[%s4176_s6 + $0x38] sm:$0xf] }
  0xa3   : > { %v557_v63 = vpop.permute.xlu1 %556  ;;  %v545_v1 = vpop.permute.xlu0 %544 }
  0xa4   : > { %v1342_v2 = vmul.bf16 1009007652, %v1310_v59  ;;  %v1341_v4 = vmul.bf16 1009007652, %v1309_v60  ;;  %v565_v5 = vrot.slane %v557_v63, %v3609_v19  ;;  %v553_v6 = vrot.slane %v545_v1, %v3609_v19  ;;  %1904 = vperm.xlu1 %3193, %v1787_v57   ;;  %1892 = vperm.xlu0 %3192, %v1786_v58  }
  0xa5   : > { %1649 = vmatprep.subr.bf16.mxu0 %v3095_v61 }
  0xa6   : > { %v1374_v9 = vmax.bf16 %v1342_v2, %v1310_v59  ;;  %v1373_v10 = vmax.bf16 %v1341_v4, %v1309_v60  ;;  %1650 = vmatpush1.bf16.msra.mxu0 %v3094_v62  ;;  %v860_v12 = vmul.bf16 %v3617_v22, %v565_v5  ;;  %v859_v13 = vmul.bf16 %v3617_v22, %v553_v6  ;;  %v2288_v5 = vld [vmem:[%s4176_s6 + $0x34] sm:$0xf]  ;;  %v2287_v6 = vld [vmem:[%s4176_s6 + $0x30] sm:$0xf] }
  0xa7   : > { %v1048_v14 = vpop.permute.xlu1 %1047  ;;  %v1036_v15 = vpop.permute.xlu0 %1035 }
  0xa8   : > { %v1056_v16 = vrot.slane %v1048_v14, %v3609_v19  ;;  %v1044_v17 = vrot.slane %v1036_v15, %v3609_v19  ;;  %1880 = vperm.xlu1 %3193, %v1785_v7   ;;  %1868 = vperm.xlu0 %3192, %v1784_v8   ;;  %v3093_v18 = vcombine.high %v1373_v10, %v1374_v9 }
  0xa9   : > { %v3092_v20 = vcombine.low %v1373_v10, %v1374_v9 }
  0xaa   : > { %v1308_v24 = vadd.bf16 %v1056_v16, %v860_v12  ;;  %v1307_v25 = vadd.bf16 %v1044_v17, %v859_v13  ;;  %1651 = vmatprep.subr.bf16.mxu0 %v3093_v18  ;;  %v2286_v16 = vld [vmem:[%s4176_s6 + $0x2c] sm:$0xf]  ;;  %v2285_v17 = vld [vmem:[%s4176_s6 + $0x28] sm:$0xf] }
  0xab   : > { %v533_v26 = vpop.permute.xlu1 %532  ;;  %v521_v27 = vpop.permute.xlu0 %520  ;;  %1652 = vmatpush1.bf16.msra.mxu0 %v3092_v20 }
  0xac   : > { %v1340_v28 = vmul.bf16 1009007652, %v1308_v24  ;;  %v1339_v29 = vmul.bf16 1009007652, %v1307_v25  ;;  %v541_v30 = vrot.slane %v533_v26, %v3609_v19  ;;  %v529_v31 = vrot.slane %v521_v27, %v3609_v19  ;;  %1856 = vperm.xlu1 %3193, %v1783_v21   ;;  %1844 = vperm.xlu0 %3192, %v1782_v23  }
  0xae   : > { %v1372_v34 = vmax.bf16 %v1340_v28, %v1308_v24  ;;  %v1371_v35 = vmax.bf16 %v1339_v29, %v1307_v25  ;;  %v858_v36 = vmul.bf16 %v3617_v22, %v541_v30  ;;  %v857_v37 = vmul.bf16 %v3617_v22, %v529_v31  ;;  %v2284_v30 = vld [vmem:[%s4176_s6 + $0x24] sm:$0xf]  ;;  %v2283_v31 = vld [vmem:[%s4176_s6 + $0x20] sm:$0xf] }
  0xaf   : > { %v1024_v38 = vpop.permute.xlu1 %1023  ;;  %v1012_v39 = vpop.permute.xlu0 %1011 }
  0xb0   : > { %v1032_v40 = vrot.slane %v1024_v38, %v3609_v19  ;;  %v1020_v41 = vrot.slane %v1012_v39, %v3609_v19  ;;  %1832 = vperm.xlu1 %3193, %v1781_v32   ;;  %1820 = vperm.xlu0 %3192, %v1780_v33   ;;  %v3091_v42 = vcombine.high %v1371_v35, %v1372_v34 }
  0xb1   : > { %v3090_v43 = vcombine.low %v1371_v35, %v1372_v34 }
  0xb2   : > { %v1306_v46 = vadd.bf16 %v1032_v40, %v858_v36  ;;  %v1305_v47 = vadd.bf16 %v1020_v41, %v857_v37  ;;  %1653 = vmatprep.subr.bf16.mxu0 %v3091_v42  ;;  %v2282_v40 = vld [vmem:[%s4176_s6 + $0x1c] sm:$0xf]  ;;  %v2281_v41 = vld [vmem:[%s4176_s6 + $0x18] sm:$0xf] }
  0xb3   : > { %v509_v48 = vpop.permute.xlu1 %508  ;;  %v497_v49 = vpop.permute.xlu0 %496  ;;  %1654 = vmatpush1.bf16.msra.mxu0 %v3090_v43 }
  0xb4   : > { %v1338_v50 = vmul.bf16 1009007652, %v1306_v46  ;;  %v1337_v51 = vmul.bf16 1009007652, %v1305_v47  ;;  %v517_v52 = vrot.slane %v509_v48, %v3609_v19  ;;  %v505_v53 = vrot.slane %v497_v49, %v3609_v19  ;;  %1808 = vperm.xlu1 %3193, %v1779_v44   ;;  %1796 = vperm.xlu0 %3192, %v1778_v45  }
  0xb6   : > { %v1370_v57 = vmax.bf16 %v1338_v50, %v1306_v46  ;;  %v1369_v58 = vmax.bf16 %v1337_v51, %v1305_v47  ;;  %v856_v59 = vmul.bf16 %v3617_v22, %v517_v52  ;;  %v855_v60 = vmul.bf16 %v3617_v22, %v505_v53  ;;  %v2280_v52 = vld [vmem:[%s4176_s6 + $0x14] sm:$0xf]  ;;  %v2279_v53 = vld [vmem:[%s4176_s6 + $0x10] sm:$0xf] }
  0xb7   : > { %v1000_v61 = vpop.permute.xlu1 %999  ;;  %v988_v62 = vpop.permute.xlu0 %987 }
  0xb8   : > { %v1008_v63 = vrot.slane %v1000_v61, %v3609_v19  ;;  %v996_v1 = vrot.slane %v988_v62, %v3609_v19  ;;  %2473 = vperm.xlu1 %3193, %v2290_v55   ;;  %2461 = vperm.xlu0 %3192, %v2289_v56   ;;  %v3089_v2 = vcombine.high %v1369_v58, %v1370_v57 }
  0xb9   : > { %v3088_v4 = vcombine.low %v1369_v58, %v1370_v57 }
  0xba   : > { %v1304_v7 = vadd.bf16 %v1008_v63, %v856_v59  ;;  %v1303_v8 = vadd.bf16 %v996_v1, %v855_v60  ;;  %1655 = vmatprep.subr.bf16.mxu0 %v3089_v2  ;;  %v2278_v63 = vld [vmem:[%s4176_s6 + $0xc] sm:$0xf]  ;;  %v2277_v1 = vld [vmem:[%s4176_s6 + $0x8] sm:$0xf] }
  0xbb   : > { %v485_v9 = vpop.permute.xlu1 %484  ;;  %v473_v10 = vpop.permute.xlu0 %472  ;;  %1656 = vmatpush1.bf16.msra.mxu0 %v3088_v4 }
  0xbc   : > { %v1336_v12 = vmul.bf16 1009007652, %v1304_v7  ;;  %v1335_v13 = vmul.bf16 1009007652, %v1303_v8  ;;  %v493_v14 = vrot.slane %v485_v9, %v3609_v19  ;;  %v481_v15 = vrot.slane %v473_v10, %v3609_v19  ;;  %2449 = vperm.xlu1 %3193, %v2288_v5   ;;  %2437 = vperm.xlu0 %3192, %v2287_v6  }
  0xbe   : > { %v1368_v18 = vmax.bf16 %v1336_v12, %v1304_v7  ;;  %v1367_v20 = vmax.bf16 %v1335_v13, %v1303_v8  ;;  %v854_v21 = vmul.bf16 %v3617_v22, %v493_v14  ;;  %v853_v23 = vmul.bf16 %v3617_v22, %v481_v15  ;;  %v2276_v14 = vld [vmem:[%s4176_s6 + $0x4] sm:$0xf]  ;;  %v2275_v15 = vld [vmem:[%s4176_s6] sm:$0xf] }
  0xbf   : > { %v976_v24 = vpop.permute.xlu1 %975  ;;  %v964_v25 = vpop.permute.xlu0 %963 }
  0xc0   : > { %v984_v26 = vrot.slane %v976_v24, %v3609_v19  ;;  %v972_v27 = vrot.slane %v964_v25, %v3609_v19  ;;  %2425 = vperm.xlu1 %3193, %v2286_v16   ;;  %2413 = vperm.xlu0 %3192, %v2285_v17   ;;  %v3087_v28 = vcombine.high %v1367_v20, %v1368_v18 }
  0xc1   : > { %v3086_v29 = vcombine.low %v1367_v20, %v1368_v18 }
  0xc2   : > { %v1302_v32 = vadd.bf16 %v984_v26, %v854_v21  ;;  %v1301_v33 = vadd.bf16 %v972_v27, %v853_v23  ;;  %1657 = vmatprep.subr.bf16.mxu0 %v3087_v28  ;;  %v2693_v26 = vld [vmem:[%s4178_s8 + $0x4] sm:$0xf]  ;;  %v2692_v27 = vld [vmem:[%s4178_s8] sm:$0xf] }
  0xc3   : > { %v461_v34 = vpop.permute.xlu1 %460  ;;  %v449_v35 = vpop.permute.xlu0 %448  ;;  %1658 = vmatpush1.bf16.msra.mxu0 %v3086_v29 }
  0xc4   : > { %v1334_v36 = vmul.bf16 1009007652, %v1302_v32  ;;  %v1333_v37 = vmul.bf16 1009007652, %v1301_v33  ;;  %v469_v38 = vrot.slane %v461_v34, %v3609_v19  ;;  %v457_v39 = vrot.slane %v449_v35, %v3609_v19  ;;  %2401 = vperm.xlu1 %3193, %v2284_v30   ;;  %2389 = vperm.xlu0 %3192, %v2283_v31  }
  0xc6   : > { %v1366_v42 = vmax.bf16 %v1334_v36, %v1302_v32  ;;  %v1365_v43 = vmax.bf16 %v1333_v37, %v1301_v33  ;;  %v852_v44 = vmul.bf16 %v3617_v22, %v469_v38  ;;  %v851_v45 = vmul.bf16 %v3617_v22, %v457_v39  ;;  %v2695_v38 = vld [vmem:[%s4178_s8 + $0xc] sm:$0xf]  ;;  %v2694_v39 = vld [vmem:[%s4178_s8 + $0x8] sm:$0xf] }
  0xc7   : > { %v952_v46 = vpop.permute.xlu1 %951  ;;  %v940_v47 = vpop.permute.xlu0 %939 }
  0xc8   : > { %v960_v48 = vrot.slane %v952_v46, %v3609_v19  ;;  %v948_v49 = vrot.slane %v940_v47, %v3609_v19  ;;  %2377 = vperm.xlu1 %3193, %v2282_v40   ;;  %2365 = vperm.xlu0 %3192, %v2281_v41   ;;  %v3085_v50 = vcombine.high %v1365_v43, %v1366_v42 }
  0xc9   : > { %v3084_v51 = vcombine.low %v1365_v43, %v1366_v42 }
  0xca   : > { %v1300_v55 = vadd.bf16 %v960_v48, %v852_v44  ;;  %v1299_v56 = vadd.bf16 %v948_v49, %v851_v45  ;;  %1659 = vmatprep.subr.bf16.mxu0 %v3085_v50  ;;  %v2697_v48 = vld [vmem:[%s4178_s8 + $0x14] sm:$0xf]  ;;  %v2696_v49 = vld [vmem:[%s4178_s8 + $0x10] sm:$0xf] }
  0xcb   : > { %v437_v57 = vpop.permute.xlu1 %436  ;;  %v425_v58 = vpop.permute.xlu0 %424  ;;  %1660 = vmatpush1.bf16.msra.mxu0 %v3084_v51 }
  0xcc   : > { %v1332_v59 = vmul.bf16 1009007652, %v1300_v55  ;;  %v1331_v60 = vmul.bf16 1009007652, %v1299_v56  ;;  %v445_v61 = vrot.slane %v437_v57, %v3609_v19  ;;  %v433_v62 = vrot.slane %v425_v58, %v3609_v19  ;;  %2353 = vperm.xlu1 %3193, %v2280_v52   ;;  %2341 = vperm.xlu0 %3192, %v2279_v53  }
  0xce   : > { %v1364_v2 = vmax.bf16 %v1332_v59, %v1300_v55  ;;  %v1363_v4 = vmax.bf16 %v1331_v60, %v1299_v56  ;;  %v850_v5 = vmul.bf16 %v3617_v22, %v445_v61  ;;  %v849_v6 = vmul.bf16 %v3617_v22, %v433_v62  ;;  %v2699_v61 = vld [vmem:[%s4178_s8 + $0x1c] sm:$0xf]  ;;  %v2698_v62 = vld [vmem:[%s4178_s8 + $0x18] sm:$0xf] }
  0xcf   : > { %v928_v7 = vpop.permute.xlu1 %927  ;;  %v916_v8 = vpop.permute.xlu0 %915 }
  0xd0   : > { %v936_v9 = vrot.slane %v928_v7, %v3609_v19  ;;  %v924_v10 = vrot.slane %v916_v8, %v3609_v19  ;;  %2329 = vperm.xlu1 %3193, %v2278_v63   ;;  %2317 = vperm.xlu0 %3192, %v2277_v1   ;;  %v3083_v12 = vcombine.high %v1363_v4, %v1364_v2 }
  0xd1   : > { %v3082_v13 = vcombine.low %v1363_v4, %v1364_v2 }
  0xd2   : > { %v1298_v16 = vadd.bf16 %v936_v9, %v850_v5  ;;  %v1297_v17 = vadd.bf16 %v924_v10, %v849_v6  ;;  %1661 = vmatprep.subr.bf16.mxu0 %v3083_v12  ;;  %v2861_v9 = vld [vmem:[%s4179_s9 + $0x8] sm:$0xff]  ;;  %v2860_v10 = vld [vmem:[%s4179_s9] sm:$0xff] }
  0xd3   : > { %v797_v18 = vpop.permute.xlu1 %796  ;;  %v785_v20 = vpop.permute.xlu0 %784  ;;  %1662 = vmatpush1.bf16.msra.mxu0 %v3082_v13 }
  0xd4   : > { %v1330_v21 = vmul.bf16 1009007652, %v1298_v16  ;;  %v1329_v23 = vmul.bf16 1009007652, %v1297_v17  ;;  %v805_v24 = vrot.slane %v797_v18, %v3609_v19  ;;  %v793_v25 = vrot.slane %v785_v20, %v3609_v19  ;;  %2305 = vperm.xlu1 %3193, %v2276_v14   ;;  %2293 = vperm.xlu0 %3192, %v2275_v15  }
  0xd6   : > { %v1362_v28 = vmax.bf16 %v1330_v21, %v1298_v16  ;;  %v1361_v29 = vmax.bf16 %v1329_v23, %v1297_v17  ;;  %v880_v30 = vmul.bf16 %v3617_v22, %v805_v24  ;;  %v879_v31 = vmul.bf16 %v3617_v22, %v793_v25  ;;  %v2863_v24 = vld [vmem:[%s4179_s9 + $0x18] sm:$0xff]  ;;  %v2862_v25 = vld [vmem:[%s4179_s9 + $0x10] sm:$0xff] }
  0xd7   : > { %v1288_v32 = vpop.permute.xlu1 %1287  ;;  %v1276_v33 = vpop.permute.xlu0 %1275 }
  0xd8   : > { %v1296_v34 = vrot.slane %v1288_v32, %v3609_v19  ;;  %v1284_v35 = vrot.slane %v1276_v33, %v3609_v19  ;;  %2714 = vperm.xlu1 %3193, %v2693_v26   ;;  %2702 = vperm.xlu0 %3192, %v2692_v27   ;;  %v3081_v36 = vcombine.high %v1361_v29, %v1362_v28 }
  0xd9   : > { %v3080_v37 = vcombine.low %v1361_v29, %v1362_v28 }
  0xda   : > { %v1328_v40 = vadd.bf16 %v1296_v34, %v880_v30  ;;  %v1327_v41 = vadd.bf16 %v1284_v35, %v879_v31  ;;  %1663 = vmatprep.subr.bf16.mxu0 %v3081_v36  ;;  %v2865_v34 = vld [vmem:[%s4179_s9 + $0x28] sm:$0xff]  ;;  %v2864_v35 = vld [vmem:[%s4179_s9 + $0x20] sm:$0xff] }
  0xdb   : > { %v773_v42 = vpop.permute.xlu1 %772  ;;  %v761_v43 = vpop.permute.xlu0 %760  ;;  %1664 = vmatpush1.bf16.msra.mxu0 %v3080_v37 }
  0xdc   : > { %v1360_v44 = vmul.bf16 1009007652, %v1328_v40  ;;  %v1359_v45 = vmul.bf16 1009007652, %v1327_v41  ;;  %v781_v46 = vrot.slane %v773_v42, %v3609_v19  ;;  %v769_v47 = vrot.slane %v761_v43, %v3609_v19  ;;  %2738 = vperm.xlu1 %3193, %v2695_v38   ;;  %2726 = vperm.xlu0 %3192, %v2694_v39  }
  0xde   : > { %v1392_v50 = vmax.bf16 %v1360_v44, %v1328_v40  ;;  %v1391_v51 = vmax.bf16 %v1359_v45, %v1327_v41  ;;  %v878_v52 = vmul.bf16 %v3617_v22, %v781_v46  ;;  %v877_v53 = vmul.bf16 %v3617_v22, %v769_v47  ;;  %v2867_v46 = vld [vmem:[%s4179_s9 + $0x38] sm:$0xff]  ;;  %v2866_v47 = vld [vmem:[%s4179_s9 + $0x30] sm:$0xff] }
  0xdf   : > { %v1264_v55 = vpop.permute.xlu1 %1263  ;;  %v1252_v56 = vpop.permute.xlu0 %1251 }
  0xe0   : > { %v1272_v57 = vrot.slane %v1264_v55, %v3609_v19  ;;  %v1260_v58 = vrot.slane %v1252_v56, %v3609_v19  ;;  %2762 = vperm.xlu1 %3193, %v2697_v48   ;;  %2750 = vperm.xlu0 %3192, %v2696_v49   ;;  %v3111_v59 = vcombine.high %v1391_v51, %v1392_v50 }
  0xe1   : > { %v3110_v60 = vcombine.low %v1391_v51, %v1392_v50 }
  0xe2   : > { %v1326_v63 = vadd.bf16 %v1272_v57, %v878_v52  ;;  %v1325_v1 = vadd.bf16 %v1260_v58, %v877_v53  ;;  %1665 = vmatprep.subr.bf16.mxu0 %v3111_v59  ;;  %v2950_v57 = vld [vmem:[#allocation2] sm:$0x1] }
  0xe3   : > { %v749_v2 = vpop.permute.xlu1 %748  ;;  %v737_v4 = vpop.permute.xlu0 %736  ;;  %1666 = vmatpush2.bf16.msra.mxu0 %v3110_v60 }
  0xe4   : > { %v1358_v5 = vmul.bf16 1009007652, %v1326_v63  ;;  %v1357_v6 = vmul.bf16 1009007652, %v1325_v1  ;;  %v757_v7 = vrot.slane %v749_v2, %v3609_v19  ;;  %v745_v8 = vrot.slane %v737_v4, %v3609_v19  ;;  %2786 = vperm.xlu1 %3193, %v2699_v61   ;;  %2774 = vperm.xlu0 %3192, %v2698_v62  }
  0xe6   : > { %v1390_v12 = vmax.bf16 %v1358_v5, %v1326_v63  ;;  %v1389_v13 = vmax.bf16 %v1357_v6, %v1325_v1  ;;  %v876_v14 = vmul.bf16 %v3617_v22, %v757_v7  ;;  %v875_v15 = vmul.bf16 %v3617_v22, %v745_v8 }
  0xe7   : > { %v1240_v16 = vpop.permute.xlu1 %1239  ;;  %v1228_v17 = vpop.permute.xlu0 %1227 }
  0xe8   : > { %v1248_v18 = vrot.slane %v1240_v16, %v3609_v19  ;;  %v1236_v20 = vrot.slane %v1228_v17, %v3609_v19  ;;  %2875 = vperm.xlu1 %3193, %v2861_v9   ;;  %2870 = vperm.xlu0 %3192, %v2860_v10   ;;  %v3109_v21 = vcombine.high %v1389_v13, %v1390_v12 }
  0xe9   : > { %v3108_v23 = vcombine.low %v1389_v13, %v1390_v12 }
  0xea   : > { %v1324_v26 = vadd.bf16 %v1248_v18, %v876_v14  ;;  %v1323_v27 = vadd.bf16 %v1236_v20, %v875_v15  ;;  %1667 = vmatprep.subr.bf16.mxu0 %v3109_v21 }
  0xeb   : > { %v725_v28 = vpop.permute.xlu1 %724  ;;  %v713_v29 = vpop.permute.xlu0 %712  ;;  %1668 = vmatpush2.bf16.msra.mxu0 %v3108_v23 }
  0xec   : > { %v1356_v30 = vmul.bf16 1009007652, %v1324_v26  ;;  %v1355_v31 = vmul.bf16 1009007652, %v1323_v27  ;;  %v733_v32 = vrot.slane %v725_v28, %v3609_v19  ;;  %v721_v33 = vrot.slane %v713_v29, %v3609_v19  ;;  %2885 = vperm.xlu1 %3193, %v2863_v24   ;;  %2880 = vperm.xlu0 %3192, %v2862_v25  }
  0xee   : > { %v1388_v36 = vmax.bf16 %v1356_v30, %v1324_v26  ;;  %v1387_v37 = vmax.bf16 %v1355_v31, %v1323_v27  ;;  %v874_v38 = vmul.bf16 %v3617_v22, %v733_v32  ;;  %v873_v39 = vmul.bf16 %v3617_v22, %v721_v33 }
  0xef   : > { %v1216_v40 = vpop.permute.xlu1 %1215  ;;  %v1204_v41 = vpop.permute.xlu0 %1203 }
  0xf0   : > { %v1224_v42 = vrot.slane %v1216_v40, %v3609_v19  ;;  %v1212_v43 = vrot.slane %v1204_v41, %v3609_v19  ;;  %2895 = vperm.xlu1 %3193, %v2865_v34   ;;  %2890 = vperm.xlu0 %3192, %v2864_v35   ;;  %v3107_v44 = vcombine.high %v1387_v37, %v1388_v36 }
  0xf1   : > { %v3106_v45 = vcombine.low %v1387_v37, %v1388_v36 }
  0xf2   : > { %v1322_v48 = vadd.bf16 %v1224_v42, %v874_v38  ;;  %v1321_v49 = vadd.bf16 %v1212_v43, %v873_v39  ;;  %1669 = vmatprep.subr.bf16.mxu0 %v3107_v44 }
  0xf3   : > { %v701_v50 = vpop.permute.xlu1 %700  ;;  %v689_v51 = vpop.permute.xlu0 %688  ;;  %1670 = vmatpush2.bf16.msra.mxu0 %v3106_v45 }
  0xf4   : > { %v1354_v52 = vmul.bf16 1009007652, %v1322_v48  ;;  %v1353_v53 = vmul.bf16 1009007652, %v1321_v49  ;;  %v709_v55 = vrot.slane %v701_v50, %v3609_v19  ;;  %v697_v56 = vrot.slane %v689_v51, %v3609_v19  ;;  %2905 = vperm.xlu1 %3193, %v2867_v46   ;;  %2900 = vperm.xlu0 %3192, %v2866_v47  }
  0xf6   : > { %v1386_v58 = vmax.bf16 %v1354_v52, %v1322_v48  ;;  %v1385_v59 = vmax.bf16 %v1353_v53, %v1321_v49  ;;  %v872_v60 = vmul.bf16 %v3617_v22, %v709_v55  ;;  %v871_v61 = vmul.bf16 %v3617_v22, %v697_v56 }
  0xf7   : > { %v1192_v62 = vpop.permute.xlu1 %1191  ;;  %v1180_v63 = vpop.permute.xlu0 %1179 }
  0xf8   : > { %v1200_v1 = vrot.slane %v1192_v62, %v3609_v19  ;;  %v1188_v2 = vrot.slane %v1180_v63, %v3609_v19  ;;  %2953 = vperm.xlu0 %3192, %v2950_v57   ;;  %v3105_v4 = vcombine.high %v1385_v59, %v1386_v58  ;;  %v3104_v5 = vcombine.low %v1385_v59, %v1386_v58 }
  0xfa   : > { %v1320_v6 = vadd.bf16 %v1200_v1, %v872_v60  ;;  %v1319_v7 = vadd.bf16 %v1188_v2, %v871_v61  ;;  %1671 = vmatprep.subr.bf16.mxu0 %v3105_v4 }
  0xfb   : > { %v677_v8 = vpop.permute.xlu1 %676  ;;  %v665_v9 = vpop.permute.xlu0 %664  ;;  %1672 = vmatpush2.bf16.msra.mxu0 %v3104_v5 }
  0xfc   : > { %v1352_v10 = vmul.bf16 1009007652, %v1320_v6  ;;  %v1351_v12 = vmul.bf16 1009007652, %v1319_v7  ;;  %v685_v13 = vrot.slane %v677_v8, %v3609_v19  ;;  %v673_v14 = vrot.slane %v665_v9, %v3609_v19 }
  0xfe   : > { %v1384_v15 = vmax.bf16 %v1352_v10, %v1320_v6  ;;  %v1383_v16 = vmax.bf16 %v1351_v12, %v1319_v7  ;;  %v870_v17 = vmul.bf16 %v3617_v22, %v685_v13  ;;  %v869_v18 = vmul.bf16 %v3617_v22, %v673_v14  ;;  %v3197_v10 = vld [vmem:[%s4173_s3 + $0x14] ss:$8 sps:$4 sm:$0xff]   ;;  %v3199_v12 = vld [vmem:[%s4173_s3 + $0x10] ss:$8 sps:$4 sm:$0xff]   ;;  %v3200_v13 = vld [vmem:[%s4173_s3 + $0x24] ss:$8 sps:$4 sm:$0xff]  }
  0xff   : > { %v1168_v20 = vpop.permute.xlu1 %1167  ;;  %v1156_v21 = vpop.permute.xlu0 %1155  ;;  %v3202_v14 = vld [vmem:[%s4173_s3 + $0x20] ss:$8 sps:$4 sm:$0xff]  }
 0x100   : > { %v1176_v23 = vrot.slane %v1168_v20, %v3609_v19  ;;  %v1164_v24 = vrot.slane %v1156_v21, %v3609_v19  ;;  %v3103_v25 = vcombine.high %v1383_v16, %v1384_v15  ;;  %v3102_v26 = vcombine.low %v1383_v16, %v1384_v15  ;;  %v3203_v15 = vld [vmem:[%s4173_s3 + $0x34] ss:$8 sps:$4 sm:$0xff]   ;;  %v3205_v16 = vld [vmem:[%s4173_s3 + $0x30] ss:$8 sps:$4 sm:$0xff]  }
 0x101   : > { %v3209_v20 = vld [vmem:[%s4173_s3 + $0x54] ss:$8 sps:$4 sm:$0xff]   ;;  %v3211_v21 = vld [vmem:[%s4173_s3 + $0x50] ss:$8 sps:$4 sm:$0xff]  }
 0x102   : > { %v1318_v27 = vadd.bf16 %v1176_v23, %v870_v17  ;;  %v1317_v28 = vadd.bf16 %v1164_v24, %v869_v18  ;;  %1673 = vmatprep.subr.bf16.mxu0 %v3103_v25  ;;  %v3206_v17 = vld [vmem:[%s4173_s3 + $0x44] ss:$8 sps:$4 sm:$0xff]   ;;  %v3208_v18 = vld [vmem:[%s4173_s3 + $0x40] ss:$8 sps:$4 sm:$0xff]   ;;  %v3215_v25 = vld [vmem:[%s4173_s3 + $0x74] ss:$8 sps:$4 sm:$0xff]  }
 0x103   : > { %v653_v29 = vpop.permute.xlu1 %652  ;;  %v641_v30 = vpop.permute.xlu0 %640  ;;  %1674 = vmatpush2.bf16.msra.mxu0 %v3102_v26  ;;  %v3212_v23 = vld [vmem:[%s4173_s3 + $0x64] ss:$8 sps:$4 sm:$0xff]   ;;  %v3214_v24 = vld [vmem:[%s4173_s3 + $0x60] ss:$8 sps:$4 sm:$0xff]   ;;  %v3217_v26 = vld [vmem:[%s4173_s3 + $0x70] ss:$8 sps:$4 sm:$0xff]  }
 0x104   : > { %v1350_v31 = vmul.bf16 1009007652, %v1318_v27  ;;  %v1349_v32 = vmul.bf16 1009007652, %v1317_v28  ;;  %v661_v33 = vrot.slane %v653_v29, %v3609_v19  ;;  %v649_v34 = vrot.slane %v641_v30, %v3609_v19 }
 0x106   : > { %v1382_v35 = vmax.bf16 %v1350_v31, %v1318_v27  ;;  %v1381_v36 = vmax.bf16 %v1349_v32, %v1317_v28  ;;  %v868_v37 = vmul.bf16 %v3617_v22, %v661_v33  ;;  %v867_v38 = vmul.bf16 %v3617_v22, %v649_v34 }
 0x107   : > { %v1144_v39 = vpop.permute.xlu1 %1143  ;;  %v1132_v40 = vpop.permute.xlu0 %1131 }
 0x108   : > { %v1152_v41 = vrot.slane %v1144_v39, %v3609_v19  ;;  %v1140_v42 = vrot.slane %v1132_v40, %v3609_v19  ;;  %v3101_v43 = vcombine.high %v1381_v36, %v1382_v35  ;;  %v3100_v44 = vcombine.low %v1381_v36, %v1382_v35 }
 0x10a   : > { %v1316_v45 = vadd.bf16 %v1152_v41, %v868_v37  ;;  %v1315_v46 = vadd.bf16 %v1140_v42, %v867_v38  ;;  %1675 = vmatprep.subr.bf16.mxu0 %v3101_v43 }
 0x10b   : > { %v629_v47 = vpop.permute.xlu1 %628  ;;  %v617_v48 = vpop.permute.xlu0 %616  ;;  %1676 = vmatpush2.bf16.msra.mxu0 %v3100_v44 }
 0x10c   : > { %v1348_v49 = vmul.bf16 1009007652, %v1316_v45  ;;  %v1347_v50 = vmul.bf16 1009007652, %v1315_v46  ;;  %v637_v51 = vrot.slane %v629_v47, %v3609_v19  ;;  %v625_v52 = vrot.slane %v617_v48, %v3609_v19 }
 0x10e   : > { %v1380_v53 = vmax.bf16 %v1348_v49, %v1316_v45  ;;  %v1379_v55 = vmax.bf16 %v1347_v50, %v1315_v46  ;;  %v866_v56 = vmul.bf16 %v3617_v22, %v637_v51  ;;  %v865_v57 = vmul.bf16 %v3617_v22, %v625_v52  ;;  %v3194_v22 = vld [vmem:[%s4173_s3] ss:$8 sps:$4 sm:$0xff]  }
 0x10f   : > { %v1120_v58 = vpop.permute.xlu1 %1119  ;;  %v1108_v59 = vpop.permute.xlu0 %1107 }
 0x110   : > { %v1128_v60 = vrot.slane %v1120_v58, %v3609_v19  ;;  %v1116_v61 = vrot.slane %v1108_v59, %v3609_v19  ;;  %v3099_v62 = vcombine.high %v1379_v55, %v1380_v53  ;;  %v3098_v63 = vcombine.low %v1379_v55, %v1380_v53 }
 0x112   : > { %v1314_v1 = vadd.bf16 %v1128_v60, %v866_v56  ;;  %v1313_v2 = vadd.bf16 %v1116_v61, %v865_v57  ;;  %1677 = vmatprep.subr.bf16.mxu0 %v3099_v62 }
 0x113   : > { %1678 = vmatpush2.bf16.msra.mxu0 %v3098_v63  ;;  %v1977_v49 = vpop.permute.xlu1 %1976  ;;  %v1965_v50 = vpop.permute.xlu0 %1964 }
 0x114   : > { %v1346_v4 = vmul.bf16 1009007652, %v1314_v1  ;;  %v1345_v5 = vmul.bf16 1009007652, %v1313_v2 }
 0x116   : > { %v1378_v6 = vmax.bf16 %v1346_v4, %v1314_v1  ;;  %v1377_v7 = vmax.bf16 %v1345_v5, %v1313_v2 }
 0x117   : > { %v1953_v55 = vpop.permute.xlu1 %1952  ;;  %v1941_v56 = vpop.permute.xlu0 %1940 }
 0x118   : > { %v3097_v8 = vcombine.high %v1377_v7, %v1378_v6  ;;  %v3096_v9 = vcombine.low %v1377_v7, %v1378_v6  ;;  %v1985_v6 = vrot.slane %v1977_v49, %v3609_v19  ;;  %v1973_v7 = vrot.slane %v1965_v50, %v3609_v19 }
 0x11a   : > { %1679 = vmatprep.subr.bf16.mxu0 %v3097_v8 }
 0x11b   : > { %1680 = vmatpush2.bf16.msra.mxu0 %v3096_v9  ;;  %v1929_v60 = vpop.permute.xlu1 %1928  ;;  %v1917_v61 = vpop.permute.xlu0 %1916  ;;  %v1961_v9 = vrot.slane %v1953_v55, %v3609_v19 }
 0x11e   : > { %1682 = vmatmul.mubr.bf16.vlgmr.msra.gmra.mxu0 %v3194_v22  ;;  %v1949_v22 = vrot.slane %v1941_v56, %v3609_v19 }
 0x11f   : > { %1691 = vmatprep.mubr.bf16.mxu0 %v3197_v10  ;;  %v1905_v2 = vpop.permute.xlu1 %1904  ;;  %v1893_v4 = vpop.permute.xlu0 %1892 }
 0x120   : > { %v1913_v56 = vrot.slane %v1905_v2, %v3609_v19 }
 0x126   : > { %1692 = vmatmul.mubr.bf16.gmra.mxu0 %v3199_v12  ;;  %v1881_v12 = vpop.permute.xlu1 %1880 }
 0x127   : > { %1701 = vmatprep.mubr.bf16.mxu0 %v3200_v13 }
 0x12e   : > { %1702 = vmatmul.mubr.bf16.gmra.mxu0 %v3202_v14  ;;  %v3119_v14 = vcombine.low %v1973_v7, %v1985_v6  ;;  %v1857_v6 = vpop.permute.xlu1 %1856 }
 0x12f   : > { %1711 = vmatprep.mubr.bf16.mxu0 %v3203_v15  ;;  %v1869_v15 = vpop.permute.xlu0 %1868 }
 0x133   : > { %v1845_v7 = vpop.permute.xlu0 %1844 }
 0x136   : > { %1712 = vmatmul.mubr.bf16.gmra.mxu0 %v3205_v16 }
 0x137   : > { %1721 = vmatprep.mubr.bf16.mxu0 %v3206_v17  ;;  %v3118_v17 = vcombine.low %v1949_v22, %v1961_v9 }
 0x13e   : > { %1722 = vmatmul.mubr.bf16.gmra.mxu0 %v3208_v18  ;;  %v1937_v18 = vrot.slane %v1929_v60, %v3609_v19 }
 0x13f   : > { %1731 = vmatprep.mubr.bf16.mxu0 %v3209_v20  ;;  %v1925_v20 = vrot.slane %v1917_v61, %v3609_v19 }
 0x141   : > { %v3117_v55 = vcombine.low %v1925_v20, %v1937_v18  ;;  %v1821_v18 = vpop.permute.xlu0 %1820  ;;  %v1853_v20 = vrot.slane %v1845_v7, %v3609_v19 }
 0x146   : > { %1732 = vmatmul.mubr.bf16.gmra.mxu0 %v3211_v21 }
 0x147   : > { %1741 = vmatprep.mubr.bf16.mxu0 %v3212_v23 }
 0x14e   : > { %1742 = vmatmul.mubr.bf16.gmra.mxu0 %v3214_v24 }
 0x14f   : > { %1751 = vmatprep.mubr.bf16.mxu0 %v3215_v25 }
 0x156   : > { %1752 = vmatmul.mubr.bf16.gmra.mxu0 %v3217_v26 }
 0x1de   : > { %v3907_v27 = vpop.f32.mrf.mxu0 }
 0x1e0   : > { %v3909_v28 = vpop.f32.mrf.mxu0 }
 0x1e2   : > { %v3911_v29 = vpop.f32.mrf.mxu0 }
 0x1e3   : > { %v1762_v30 = vpack.c.bf16 %v3911_v29, %v3907_v27  ;;  %v3219_v27 = vld [vmem:[%s4175_s5 + $0x8] sm:$0xff]   ;;  %v3220_v29 = vld [vmem:[%s4175_s5 + $0x10] sm:$0xff]  }
 0x1e4   : > { %v3915_v31 = vpop.f32.mrf.mxu0 }
 0x1e5   : > { %v1763_v32 = vpack.c.bf16 %v3915_v31, %v3909_v28  ;;  %v3218_v31 = vld [vmem:[%s4175_s5] sm:$0xff]  }
 0x1e6   : > { %v3919_v33 = vpop.f32.mrf.mxu0 }
 0x1e8   : > { %v3921_v34 = vpop.f32.mrf.mxu0 }
 0x1ea   : > { %v3923_v35 = vpop.f32.mrf.mxu0 }
 0x1eb   : > { %v1764_v36 = vpack.c.bf16 %v3923_v35, %v3919_v33 }
 0x1ec   : > { %v3927_v37 = vpop.f32.mrf.mxu0 }
 0x1ed   : > { %v1765_v38 = vpack.c.bf16 %v3927_v37, %v3921_v34 }
 0x1ee   : > { %v3931_v39 = vpop.f32.mrf.mxu0 }
 0x1f0   : > { %v3933_v40 = vpop.f32.mrf.mxu0 }
 0x1f2   : > { %v3935_v41 = vpop.f32.mrf.mxu0 }
 0x1f4   : > { %v3937_v42 = vpop.f32.mrf.mxu0 }
 0x1f6   : > { %v3939_v43 = vpop.f32.mrf.mxu0 }
 0x1f8   : > { %v3941_v44 = vpop.f32.mrf.mxu0 }
 0x1fa   : > { %v3943_v45 = vpop.f32.mrf.mxu0 }
 0x1fc   : > { %v3945_v46 = vpop.f32.mrf.mxu0 }
 0x1fe   : > { %v3947_v47 = vpop.f32.mrf.mxu0 }
 0x200   : > { %v3949_v48 = vpop.f32.mrf.mxu0 }
 0x202   : > { %v3951_v51 = vpop.f32.mrf.mxu0 }
 0x203   : > { %v1770_v2 = vpack.c.bf16 %v3951_v51, %v3947_v47  ;;  %v1768_v47 = vpack.c.bf16 %v3943_v45, %v3939_v43  ;;  %v1766_v43 = vpack.c.bf16 %v3935_v41, %v3931_v39 }
 0x204   : > { %v1729_v52 = vpop.f32.mrf.mxu0 }
 0x205   : > { %v1771_v61 = vpack.c.bf16 %v1729_v52, %v3949_v48 }
 0x206   : > { %v1733_v53 = vpop.f32.mrf.mxu0 }
 0x208   : > { %v1735_v57 = vpop.f32.mrf.mxu0 }
 0x20a   : > { %v1737_v58 = vpop.f32.mrf.mxu0 }
 0x20b   : > { %v1772_v9 = vpack.c.bf16 %v1737_v58, %v1733_v53  ;;  %v1769_v53 = vpack.c.bf16 %v3945_v46, %v3941_v44  ;;  %v1767_v44 = vpack.c.bf16 %v3937_v42, %v3933_v40 }
 0x20c   : > { %v1739_v59 = vpop.f32.mrf.mxu0 }
 0x20d   : > { %v1773_v25 = vpack.c.bf16 %v1739_v59, %v1735_v57  ;;  %v1889_v59 = vrot.slane %v1881_v12, %v3609_v19 }
 0x20e   : > { %v1743_v62 = vpop.f32.mrf.mxu0 }
 0x210   : > { %v1745_v63 = vpop.f32.mrf.mxu0 }
 0x212   : > { %v1747_v1 = vpop.f32.mrf.mxu0 }
 0x213   : > { %v1774_v23 = vpack.c.bf16 %v1747_v1, %v1743_v62 }
 0x214   : > { %v1749_v5 = vpop.f32.mrf.mxu0 }
 0x215   : > { %v1775_v13 = vpack.c.bf16 %v1749_v5, %v1745_v63  ;;  %v1901_v63 = vrot.slane %v1893_v4, %v3609_v19  ;;  %v2046_v22 = vadd.bf16 %v3118_v17, %v1774_v23  ;;  %v2044_v4 = vadd.bf16 %v3117_v55, %v1772_v9 }
 0x216   : > { %v1753_v8 = vpop.f32.mrf.mxu0 }
 0x217   : > { %v2047_v26 = vadd.bf16 %v3118_v17, %v1775_v13  ;;  %v3116_v57 = vcombine.low %v1901_v63, %v1913_v56  ;;  %v1833_v17 = vpop.permute.xlu1 %1832  ;;  %v1797_v56 = vpop.permute.xlu0 %1796 }
 0x218   : > { %v1755_v10 = vpop.f32.mrf.mxu0 }
 0x219   : > { %v2063_v62 = vmul.bf16 1009007652, %v2047_v26  ;;  %v2043_v58 = vadd.bf16 %v3116_v57, %v1771_v61  ;;  %v2042_v51 = vadd.bf16 %v3116_v57, %v1770_v2 }
 0x21a   : > { %v1757_v16 = vpop.f32.mrf.mxu0 }
 0x21b   : > { %v1776_v21 = vpack.c.bf16 %v1757_v16, %v1753_v8  ;;  %v2045_v8 = vadd.bf16 %v3117_v55, %v1773_v25  ;;  %v2079_v52 = vmax.bf16 %v2063_v62, %v2047_v26  ;;  %v1809_v55 = vpop.permute.xlu1 %1808  ;;  %v2058_v63 = vmul.bf16 1009007652, %v2042_v51 }
 0x21c   : > { %v1759_v24 = vpop.f32.mrf.mxu0  ;;  %v1817_v9 = vrot.slane %v1809_v55, %v3609_v19 }
 0x21d   : > { %v2048_v49 = vadd.bf16 %v3119_v14, %v1776_v21  ;;  %v1777_v50 = vpack.c.bf16 %v1759_v24, %v1755_v10  ;;  %v1877_v10 = vrot.slane %v1869_v15, %v3609_v19  ;;  %v2061_v48 = vmul.bf16 1009007652, %v2045_v8 }
 0x21e   : > { %v1865_v15 = vrot.slane %v1857_v6, %v3609_v19  ;;  %v2060_v21 = vmul.bf16 1009007652, %v2044_v4  ;;  %v2059_v24 = vmul.bf16 1009007652, %v2043_v58 }
 0x21f   : > { %v2049_v5 = vadd.bf16 %v3119_v14, %v1777_v50  ;;  %v2064_v60 = vmul.bf16 1009007652, %v2048_v49  ;;  %v2062_v14 = vmul.bf16 1009007652, %v2046_v22  ;;  %v3115_v12 = vcombine.low %v1877_v10, %v1889_v59 }
 0x220   : > { %v2077_v25 = vmax.bf16 %v2061_v48, %v2045_v8  ;;  %v3114_v26 = vcombine.low %v1853_v20, %v1865_v15  ;;  %v1829_v50 = vrot.slane %v1821_v18, %v3609_v19  ;;  %v2075_v42 = vmax.bf16 %v2059_v24, %v2043_v58  ;;  %v3224_v58 = vld [vmem:[%s4175_s5 + $0x30] sm:$0xff]   ;;  %v3225_v48 = vld [vmem:[%s4175_s5 + $0x38] sm:$0xff]  }
 0x221   : > { %v2065_v1 = vmul.bf16 1009007652, %v2049_v5  ;;  %v2080_v16 = vmax.bf16 %v2064_v60, %v2048_v49  ;;  %v2078_v23 = vmax.bf16 %v2062_v14, %v2046_v22  ;;  %v2041_v46 = vadd.bf16 %v3115_v12, %v1769_v53  ;;  %v3223_v53 = vld [vmem:[%s4175_s5 + $0x28] sm:$0xff]  }
 0x222   : > { %v1841_v49 = vrot.slane %v1833_v17, %v3609_v19  ;;  %v2040_v45 = vadd.bf16 %v3115_v12, %v1768_v47  ;;  %v2039_v6 = vadd.bf16 %v3114_v26, %v1767_v44  ;;  %v1805_v22 = vrot.slane %v1797_v56, %v3609_v19 }
 0x223   : > { %v2081_v13 = vmax.bf16 %v2065_v1, %v2049_v5  ;;  %v2076_v5 = vmax.bf16 %v2060_v21, %v2044_v4  ;;  %v2057_v40 = vmul.bf16 1009007652, %v2041_v46  ;;  %v2038_v60 = vadd.bf16 %v3114_v26, %v1766_v43 }
 0x224   : > { %v3113_v7 = vcombine.low %v1829_v50, %v1841_v49  ;;  %v2056_v61 = vmul.bf16 1009007652, %v2040_v45  ;;  %v2074_v8 = vmax.bf16 %v2058_v63, %v2042_v51  ;;  %v2055_v41 = vmul.bf16 1009007652, %v2039_v6 }
 0x225   : > { %2146 = vmatprep.subr.bf16.mxu1 %v2081_v13  ;;  %v2073_v62 = vmax.bf16 %v2057_v40, %v2041_v46  ;;  %v3112_v1 = vcombine.low %v1805_v22, %v1817_v9  ;;  %v2054_v59 = vmul.bf16 1009007652, %v2038_v60 }
 0x226   : > { %2147 = vmatpush1.bf16.msra.mxu1 %v2080_v16  ;;  %v2037_v39 = vadd.bf16 %v3113_v7, %v1765_v38  ;;  %v2036_v57 = vadd.bf16 %v3113_v7, %v1764_v36  ;;  %v2072_v10 = vmax.bf16 %v2056_v61, %v2040_v45  ;;  %v2071_v4 = vmax.bf16 %v2055_v41, %v2039_v6  ;;  %v2462_v6 = vpop.permute.xlu0 %2461 }
 0x227   : > { %2148 = vmatprep.subr.bf16.mxu1 %v2079_v52  ;;  %v2035_v13 = vadd.bf16 %v3112_v1, %v1763_v32  ;;  %v2034_v34 = vadd.bf16 %v3112_v1, %v1762_v30  ;;  %v2070_v38 = vmax.bf16 %v2054_v59, %v2038_v60  ;;  %v3221_v30 = vld [vmem:[%s4175_s5 + $0x18] sm:$0xff]   ;;  %v3222_v32 = vld [vmem:[%s4175_s5 + $0x20] sm:$0xff]  }
 0x228   : > { %v2053_v2 = vmul.bf16 1009007652, %v2037_v39  ;;  %v2052_v37 = vmul.bf16 1009007652, %v2036_v57 }
 0x229   : > { %v2051_v14 = vmul.bf16 1009007652, %v2035_v13  ;;  %v2050_v33 = vmul.bf16 1009007652, %v2034_v34 }
 0x22a   : > { %2149 = vmatpush1.bf16.msra.mxu1 %v2078_v23  ;;  %v2069_v16 = vmax.bf16 %v2053_v2, %v2037_v39  ;;  %v2068_v35 = vmax.bf16 %v2052_v37, %v2036_v57  ;;  %v2438_v22 = vpop.permute.xlu0 %2437 }
 0x22b   : > { %2150 = vmatprep.subr.bf16.mxu1 %v2077_v25  ;;  %v2067_v36 = vmax.bf16 %v2051_v14, %v2035_v13  ;;  %v2066_v28 = vmax.bf16 %v2050_v33, %v2034_v34 }
 0x22e   : > { %2151 = vmatpush1.bf16.msra.mxu1 %v2076_v5  ;;  %v2474_v5 = vpop.permute.xlu1 %2473  ;;  %v2414_v41 = vpop.permute.xlu0 %2413 }
 0x22f   : > { %2152 = vmatprep.subr.bf16.mxu1 %v2075_v42  ;;  %v2482_v2 = vrot.slane %v2474_v5, %v3609_v19 }
 0x232   : > { %2153 = vmatpush1.bf16.msra.mxu1 %v2074_v8  ;;  %v2450_v9 = vpop.permute.xlu1 %2449 }
 0x233   : > { %2154 = vmatprep.subr.bf16.mxu1 %v2073_v62  ;;  %v2458_v37 = vrot.slane %v2450_v9, %v3609_v19 }
 0x236   : > { %2155 = vmatpush1.bf16.msra.mxu1 %v2072_v10  ;;  %v2426_v39 = vpop.permute.xlu1 %2425  ;;  %v2390_v10 = vpop.permute.xlu0 %2389 }
 0x237   : > { %2156 = vmatprep.subr.bf16.mxu1 %v2071_v4  ;;  %v2470_v4 = vrot.slane %v2462_v6, %v3609_v19 }
 0x23a   : > { %2157 = vmatpush1.bf16.msra.mxu1 %v2070_v38  ;;  %v2402_v59 = vpop.permute.xlu1 %2401  ;;  %v2446_v38 = vrot.slane %v2438_v22, %v3609_v19 }
 0x23b   : > { %2158 = vmatprep.subr.bf16.mxu1 %v2069_v16  ;;  %v2410_v22 = vrot.slane %v2402_v59, %v3609_v19 }
 0x23e   : > { %2159 = vmatpush1.bf16.msra.mxu1 %v2068_v35  ;;  %v2378_v16 = vpop.permute.xlu1 %2377  ;;  %v3135_v35 = vcombine.low %v2470_v4, %v2482_v2 }
 0x23f   : > { %2160 = vmatprep.subr.bf16.mxu1 %v2067_v36  ;;  %v2366_v36 = vpop.permute.xlu0 %2365 }
 0x242   : > { %2161 = vmatpush1.bf16.msra.mxu1 %v2066_v28  ;;  %v2354_v2 = vpop.permute.xlu1 %2353 }
 0x243   : > { %v2342_v4 = vpop.permute.xlu0 %2341 }
 0x245   : > { %2179 = vmatmul.mubr.bf16.vlgmr.msra.gmra.mxu1 %v3218_v31  ;;  %v3134_v31 = vcombine.low %v2446_v38, %v2458_v37 }
 0x246   : > { %2188 = vmatprep.mubr.bf16.mxu1 %v3292_v3 }
 0x24d   : > { %2189 = vmatmul.mubr.bf16.gmra.mxu1 %v3219_v27  ;;  %v2434_v27 = vrot.slane %v2426_v39, %v3609_v19 }
 0x24e   : > { %2198 = vmatprep.mubr.bf16.mxu1 %v3292_v3 }
 0x255   : > { %2199 = vmatmul.mubr.bf16.gmra.mxu1 %v3220_v29  ;;  %v2422_v29 = vrot.slane %v2414_v41, %v3609_v19 }
 0x256   : > { %2208 = vmatprep.mubr.bf16.mxu1 %v3292_v3 }
 0x257   : > { %v3133_v9 = vcombine.low %v2422_v29, %v2434_v27  ;;  %v2318_v27 = vpop.permute.xlu0 %2317  ;;  %v2350_v29 = vrot.slane %v2342_v4, %v3609_v19 }
 0x25d   : > { %2209 = vmatmul.mubr.bf16.gmra.mxu1 %v3221_v30 }
 0x25e   : > { %2218 = vmatprep.mubr.bf16.mxu1 %v3292_v3 }
 0x265   : > { %2219 = vmatmul.mubr.bf16.gmra.mxu1 %v3222_v32 }
 0x266   : > { %2228 = vmatprep.mubr.bf16.mxu1 %v3292_v3 }
 0x26d   : > { %2229 = vmatmul.mubr.bf16.gmra.mxu1 %v3223_v53 }
 0x26e   : > { %2238 = vmatprep.mubr.bf16.mxu1 %v3292_v3 }
 0x275   : > { %2239 = vmatmul.mubr.bf16.gmra.mxu1 %v3224_v58 }
 0x276   : > { %2248 = vmatprep.mubr.bf16.mxu1 %v3292_v3 }
 0x27d   : > { %2249 = vmatmul.mubr.bf16.gmra.mxu1 %v3225_v48 }
 0x27e   : > { %2643 = vmatprep.mubr.bf16.mxu1 %v3292_v3 }
 0x305   : > { %v4024_v52 = vpop.f32.mrf.mxu1 }
 0x307   : > { %v4026_v17 = vpop.f32.mrf.mxu1 }
 0x309   : > { %v4028_v18 = vpop.f32.mrf.mxu1 }
 0x30a   : > { %v2259_v12 = vpack.c.bf16 %v4028_v18, %v4024_v52  ;;  %v3227_v52 = vld [vmem:[%s4177_s7 + $0x8] sm:$0xff]   ;;  %v3228_v18 = vld [vmem:[%s4177_s7 + $0x10] sm:$0xff]  }
 0x30b   : > { %v4032_v15 = vpop.f32.mrf.mxu1 }
 0x30c   : > { %v2260_v20 = vpack.c.bf16 %v4032_v15, %v4026_v17  ;;  %v3226_v15 = vld [vmem:[%s4177_s7] sm:$0xff]  }
 0x30d   : > { %v4036_v47 = vpop.f32.mrf.mxu1 }
 0x30f   : > { %v4038_v51 = vpop.f32.mrf.mxu1 }
 0x311   : > { %v4040_v21 = vpop.f32.mrf.mxu1 }
 0x312   : > { %v2261_v23 = vpack.c.bf16 %v4040_v21, %v4036_v47 }
 0x313   : > { %v4044_v44 = vpop.f32.mrf.mxu1 }
 0x314   : > { %v2262_v46 = vpack.c.bf16 %v4044_v44, %v4038_v51 }
 0x315   : > { %v4048_v24 = vpop.f32.mrf.mxu1 }
 0x317   : > { %v4050_v25 = vpop.f32.mrf.mxu1 }
 0x319   : > { %v4052_v26 = vpop.f32.mrf.mxu1 }
 0x31b   : > { %v4054_v49 = vpop.f32.mrf.mxu1 }
 0x31d   : > { %v4056_v50 = vpop.f32.mrf.mxu1 }
 0x31f   : > { %v4058_v55 = vpop.f32.mrf.mxu1 }
 0x321   : > { %v4060_v56 = vpop.f32.mrf.mxu1 }
 0x323   : > { %v4062_v43 = vpop.f32.mrf.mxu1 }
 0x325   : > { %v4064_v45 = vpop.f32.mrf.mxu1 }
 0x327   : > { %v4066_v63 = vpop.f32.mrf.mxu1 }
 0x329   : > { %v4068_v40 = vpop.f32.mrf.mxu1 }
 0x32a   : > { %v2267_v59 = vpack.c.bf16 %v4068_v40, %v4064_v45  ;;  %v2265_v45 = vpack.c.bf16 %v4060_v56, %v4056_v50  ;;  %v2263_v50 = vpack.c.bf16 %v4052_v26, %v4048_v24 }
 0x32b   : > { %v2226_v42 = vpop.f32.mrf.mxu1 }
 0x32c   : > { %v2268_v41 = vpack.c.bf16 %v2226_v42, %v4066_v63 }
 0x32d   : > { %v2230_v7 = vpop.f32.mrf.mxu1 }
 0x32f   : > { %v2232_v60 = vpop.f32.mrf.mxu1 }
 0x331   : > { %v2234_v61 = vpop.f32.mrf.mxu1 }
 0x332   : > { %v2269_v37 = vpack.c.bf16 %v2234_v61, %v2230_v7  ;;  %v2266_v7 = vpack.c.bf16 %v4062_v43, %v4058_v55  ;;  %v2264_v55 = vpack.c.bf16 %v4054_v49, %v4050_v25 }
 0x333   : > { %v2236_v8 = vpop.f32.mrf.mxu1 }
 0x334   : > { %v2270_v58 = vpack.c.bf16 %v2236_v8, %v2232_v60  ;;  %v2386_v8 = vrot.slane %v2378_v16, %v3609_v19 }
 0x335   : > { %v2240_v62 = vpop.f32.mrf.mxu1 }
 0x337   : > { %v2242_v1 = vpop.f32.mrf.mxu1 }
 0x339   : > { %v2244_v57 = vpop.f32.mrf.mxu1 }
 0x33a   : > { %v2271_v32 = vpack.c.bf16 %v2244_v57, %v2240_v62 }
 0x33b   : > { %v2246_v13 = vpop.f32.mrf.mxu1 }
 0x33c   : > { %v2272_v33 = vpack.c.bf16 %v2246_v13, %v2242_v1  ;;  %v2398_v1 = vrot.slane %v2390_v10, %v3609_v19  ;;  %v2543_v38 = vadd.bf16 %v3134_v31, %v2271_v32  ;;  %v2541_v10 = vadd.bf16 %v3133_v9, %v2269_v37 }
 0x33d   : > { %v2250_v34 = vpop.f32.mrf.mxu1 }
 0x33e   : > { %v2544_v48 = vadd.bf16 %v3134_v31, %v2272_v33  ;;  %v3132_v60 = vcombine.low %v2398_v1, %v2410_v22  ;;  %v2330_v31 = vpop.permute.xlu1 %2329  ;;  %v2294_v22 = vpop.permute.xlu0 %2293 }
 0x33f   : > { %v2252_v14 = vpop.f32.mrf.mxu1 }
 0x340   : > { %v2560_v62 = vmul.bf16 1009007652, %v2544_v48  ;;  %v2540_v61 = vadd.bf16 %v3132_v60, %v2268_v41  ;;  %v2539_v40 = vadd.bf16 %v3132_v60, %v2267_v59 }
 0x341   : > { %v2254_v28 = vpop.f32.mrf.mxu1 }
 0x342   : > { %v2273_v30 = vpack.c.bf16 %v2254_v28, %v2250_v34  ;;  %v2542_v34 = vadd.bf16 %v3133_v9, %v2270_v58  ;;  %v2576_v42 = vmax.bf16 %v2560_v62, %v2544_v48  ;;  %v2306_v9 = vpop.permute.xlu1 %2305  ;;  %v2555_v1 = vmul.bf16 1009007652, %v2539_v40 }
 0x343   : > { %v2256_v53 = vpop.f32.mrf.mxu1  ;;  %v2314_v37 = vrot.slane %v2306_v9, %v3609_v19 }
 0x344   : > { %v2545_v5 = vadd.bf16 %v3135_v35, %v2273_v30  ;;  %v2274_v6 = vpack.c.bf16 %v2256_v53, %v2252_v14  ;;  %v2374_v14 = vrot.slane %v2366_v36, %v3609_v19  ;;  %v2558_v63 = vmul.bf16 1009007652, %v2542_v34 }
 0x345   : > { %v2362_v36 = vrot.slane %v2354_v2, %v3609_v19  ;;  %v2557_v30 = vmul.bf16 1009007652, %v2541_v10  ;;  %v2556_v53 = vmul.bf16 1009007652, %v2540_v61 }
 0x346   : > { %v2546_v13 = vadd.bf16 %v3135_v35, %v2274_v6  ;;  %v2561_v39 = vmul.bf16 1009007652, %v2545_v5  ;;  %v2559_v35 = vmul.bf16 1009007652, %v2543_v38  ;;  %v3131_v16 = vcombine.low %v2374_v14, %v2386_v8 }
 0x347   : > { %v2574_v58 = vmax.bf16 %v2558_v63, %v2542_v34  ;;  %v3130_v48 = vcombine.low %v2350_v29, %v2362_v36  ;;  %v2326_v6 = vrot.slane %v2318_v27, %v3609_v19  ;;  %v2572_v49 = vmax.bf16 %v2556_v53, %v2540_v61 }
 0x348   : > { %v2562_v57 = vmul.bf16 1009007652, %v2546_v13  ;;  %v2577_v28 = vmax.bf16 %v2561_v39, %v2545_v5  ;;  %v2575_v32 = vmax.bf16 %v2559_v35, %v2543_v38  ;;  %v2538_v43 = vadd.bf16 %v3131_v16, %v2266_v7  ;;  %v2715_v7 = vpop.permute.xlu1 %2714 }
 0x349   : > { %v2338_v5 = vrot.slane %v2330_v31, %v3609_v19  ;;  %v2537_v56 = vadd.bf16 %v3131_v16, %v2265_v45  ;;  %v2536_v2 = vadd.bf16 %v3130_v48, %v2264_v55  ;;  %v2302_v38 = vrot.slane %v2294_v22, %v3609_v19 }
 0x34a   : > { %v2578_v33 = vmax.bf16 %v2562_v57, %v2546_v13  ;;  %v2573_v13 = vmax.bf16 %v2557_v30, %v2541_v10  ;;  %v2554_v25 = vmul.bf16 1009007652, %v2538_v43  ;;  %v2535_v39 = vadd.bf16 %v3130_v48, %v2263_v50 }
 0x34b   : > { %v3129_v4 = vcombine.low %v2326_v6, %v2338_v5  ;;  %v2553_v41 = vmul.bf16 1009007652, %v2537_v56  ;;  %v2571_v34 = vmax.bf16 %v2555_v1, %v2539_v40  ;;  %v2552_v26 = vmul.bf16 1009007652, %v2536_v2 }
 0x34c   : > { %2611 = vmatprep.subr.bf16.mxu1 %v2578_v33  ;;  %v2570_v62 = vmax.bf16 %v2554_v25, %v2538_v43  ;;  %v3128_v57 = vcombine.low %v2302_v38, %v2314_v37  ;;  %v2551_v8 = vmul.bf16 1009007652, %v2535_v39  ;;  %v2739_v36 = vpop.permute.xlu1 %2738 }
 0x34d   : > { %2612 = vmatpush1.bf16.msra.mxu1 %v2577_v28  ;;  %v2534_v24 = vadd.bf16 %v3129_v4, %v2262_v46  ;;  %v2533_v60 = vadd.bf16 %v3129_v4, %v2261_v23  ;;  %v2569_v14 = vmax.bf16 %v2553_v41, %v2537_v56  ;;  %v2568_v10 = vmax.bf16 %v2552_v26, %v2536_v2 }
 0x34e   : > { %2613 = vmatprep.subr.bf16.mxu1 %v2576_v42  ;;  %v2532_v33 = vadd.bf16 %v3128_v57, %v2260_v20  ;;  %v2531_v51 = vadd.bf16 %v3128_v57, %v2259_v12  ;;  %v2567_v46 = vmax.bf16 %v2551_v8, %v2535_v39  ;;  %v3229_v12 = vld [vmem:[%s4177_s7 + $0x18] sm:$0xff]   ;;  %v2703_v20 = vpop.permute.xlu0 %2702  ;;  %v2723_v42 = vrot.slane %v2715_v7, %v3609_v19 }
 0x34f   : > { %v2550_v59 = vmul.bf16 1009007652, %v2534_v24  ;;  %v2549_v44 = vmul.bf16 1009007652, %v2533_v60  ;;  %v2711_v31 = vrot.slane %v2703_v20, %v3609_v19  ;;  %v2747_v43 = vrot.slane %v2739_v36, %v3609_v19 }
 0x350   : > { %v2548_v35 = vmul.bf16 1009007652, %v2532_v33  ;;  %v2547_v47 = vmul.bf16 1009007652, %v2531_v51  ;;  %v2763_v5 = vpop.permute.xlu1 %2762 }
 0x351   : > { %2614 = vmatpush1.bf16.msra.mxu1 %v2575_v32  ;;  %v2566_v28 = vmax.bf16 %v2550_v59, %v2534_v24  ;;  %v2565_v21 = vmax.bf16 %v2549_v44, %v2533_v60  ;;  %v3140_v45 = vcombine.low %v2711_v31, %v2723_v42  ;;  %v2771_v37 = vrot.slane %v2763_v5, %v3609_v19 }
 0x352   : > { %2615 = vmatprep.subr.bf16.mxu1 %v2574_v58  ;;  %v2564_v23 = vmax.bf16 %v2548_v35, %v2532_v33  ;;  %v2563_v17 = vmax.bf16 %v2547_v47, %v2531_v51  ;;  %v2727_v63 = vpop.permute.xlu0 %2726 }
 0x353   : > { %v2735_v53 = vrot.slane %v2727_v63, %v3609_v19 }
 0x354   : > { %v2787_v39 = vpop.permute.xlu1 %2786 }
 0x355   : > { %2616 = vmatpush1.bf16.msra.mxu1 %v2573_v13  ;;  %v3141_v56 = vcombine.low %v2735_v53, %v2747_v43 }
 0x356   : > { %2617 = vmatprep.subr.bf16.mxu1 %v2572_v49 }
 0x358   : > { %v2876_v47 = vpop.permute.xlu1 %2875 }
 0x359   : > { %2618 = vmatpush1.bf16.msra.mxu1 %v2571_v34 }
 0x35a   : > { %2619 = vmatprep.subr.bf16.mxu1 %v2570_v62 }
 0x35d   : > { %2620 = vmatpush1.bf16.msra.mxu1 %v2569_v14 }
 0x35e   : > { %2621 = vmatprep.subr.bf16.mxu1 %v2568_v10 }
 0x361   : > { %2622 = vmatpush1.bf16.msra.mxu1 %v2567_v46 }
 0x362   : > { %2623 = vmatprep.subr.bf16.mxu1 %v2566_v28 }
 0x365   : > { %2624 = vmatpush1.bf16.msra.mxu1 %v2565_v21 }
 0x366   : > { %2625 = vmatprep.subr.bf16.mxu1 %v2564_v23 }
 0x369   : > { %2626 = vmatpush1.bf16.msra.mxu1 %v2563_v17 }
 0x36c   : > { %2644 = vmatmul.mubr.bf16.vlgmr.msra.gmra.mxu1 %v3226_v15 }
 0x36d   : > { %2653 = vmatprep.mubr.bf16.mxu1 %v3292_v3 }
 0x374   : > { %2654 = vmatmul.mubr.bf16.gmra.mxu1 %v3227_v52 }
 0x375   : > { %2663 = vmatprep.mubr.bf16.mxu1 %v3292_v3 }
 0x37c   : > { %2664 = vmatmul.mubr.bf16.gmra.mxu1 %v3228_v18 }
 0x37d   : > { %2673 = vmatprep.mubr.bf16.mxu1 %v3292_v3  ;;  %v2751_v3 = vpop.permute.xlu0 %2750 }
 0x37e   : > { %v2759_v38 = vrot.slane %v2751_v3, %v3609_v19 }
 0x380   : > { %v3142_v59 = vcombine.low %v2759_v38, %v2771_v37 }
 0x381   : > { %v2775_v22 = vpop.permute.xlu0 %2774 }
 0x382   : > { %v2783_v63 = vrot.slane %v2775_v22, %v3609_v19 }
 0x384   : > { %2674 = vmatmul.mubr.bf16.gmra.mxu1 %v3229_v12  ;;  %v2795_v12 = vrot.slane %v2787_v39, %v3609_v19 }
 0x385   : > { %v2871_v62 = vpop.permute.xlu0 %2870 }
 0x389   : > { %v2881_v20 = vpop.permute.xlu0 %2880 }
 0x38d   : > { %v2891_v19 = vpop.permute.xlu0 %2890 }
 0x42c   : > { %v2645_v61 = vpop.f32.mrf.mxu1 }
 0x42e   : > { %v2647_v27 = vpop.f32.mrf.mxu1 }
 0x430   : > { %v2649_v16 = vpop.f32.mrf.mxu1 }
 0x431   : > { %v2684_v29 = vpack.c.bf16 %v2649_v16, %v2645_v61 }
 0x432   : > { %v2651_v40 = vpop.f32.mrf.mxu1 }
 0x433   : > { %v2685_v30 = vpack.c.bf16 %v2651_v40, %v2647_v27  ;;  %v2820_v32 = vadd.bf16 %v3140_v45, %v2684_v29 }
 0x434   : > { %v2655_v55 = vpop.f32.mrf.mxu1 }
 0x435   : > { %v2821_v58 = vadd.bf16 %v3140_v45, %v2685_v30  ;;  %v2828_v6 = vmul.bf16 1009007652, %v2820_v32 }
 0x436   : > { %v2657_v48 = vpop.f32.mrf.mxu1 }
 0x437   : > { %v2829_v1 = vmul.bf16 1009007652, %v2821_v58  ;;  %v2836_v2 = vmax.bf16 %v2828_v6, %v2820_v32  ;;  %v2886_v32 = vpop.permute.xlu1 %2885 }
 0x438   : > { %v2659_v9 = vpop.f32.mrf.mxu1 }
 0x439   : > { %v2686_v50 = vpack.c.bf16 %v2659_v9, %v2655_v55  ;;  %v2837_v41 = vmax.bf16 %v2829_v1, %v2821_v58  ;;  %v2844_v57 = vunpack.c.l.bf16 %v2836_v2  ;;  %v2846_v60 = vunpack.c.h.bf16 %v2836_v2 }
 0x43a   : > { %v2661_v13 = vpop.f32.mrf.mxu1 }
 0x43b   : > { %v2822_v25 = vadd.bf16 %v3141_v56, %v2686_v50  ;;  %v2687_v49 = vpack.c.bf16 %v2661_v13, %v2657_v48  ;;  %v2845_v51 = vunpack.c.l.bf16 %v2837_v41  ;;  %v2847_v44 = vunpack.c.h.bf16 %v2837_v41  ;;  %v2896_v41 = vpop.permute.xlu1 %2895 }
 0x43c   : > { %v2665_v4 = vpop.f32.mrf.mxu1  ;;  %v2908_v17 = vmul.f32 %v2871_v62, %v2844_v57  ;;  %v2910_v15 = vmul.f32 %v2876_v47, %v2846_v60  ;;  %v3143_v48 = vcombine.low %v2783_v63, %v2795_v12 }
 0x43d   : > { %v2830_v34 = vmul.bf16 1009007652, %v2822_v25  ;;  %v2823_v24 = vadd.bf16 %v3141_v56, %v2687_v49  ;;  %v2909_v42 = vmul.f32 %v2871_v62, %v2845_v51  ;;  %v2911_v31 = vmul.f32 %v2876_v47, %v2847_v44 }
 0x43e   : > { %v2667_v26 = vpop.f32.mrf.mxu1  ;;  %v2924_v40 = vadd.f32 %v2910_v15, %v2908_v17 }
 0x43f   : > { %v2838_v8 = vmax.bf16 %v2830_v34, %v2822_v25  ;;  %v2831_v14 = vmul.bf16 1009007652, %v2823_v24  ;;  %v2937_v5 = vadd.f32 %v2911_v31, %v2909_v42  ;;  %v2906_v47 = vpop.permute.xlu1 %2905 }
 0x440   : > { %v2669_v33 = vpop.f32.mrf.mxu1 }
 0x441   : > { %v2688_v10 = vpack.c.bf16 %v2669_v33, %v2665_v4  ;;  %v2848_v46 = vunpack.c.l.bf16 %v2838_v8  ;;  %v2839_v35 = vmax.bf16 %v2831_v14, %v2823_v24  ;;  %v2850_v36 = vunpack.c.h.bf16 %v2838_v8 }
 0x442   : > { %v2671_v28 = vpop.f32.mrf.mxu1 }
 0x443   : > { %v2824_v21 = vadd.bf16 %v3142_v59, %v2688_v10  ;;  %v2689_v23 = vpack.c.bf16 %v2671_v28, %v2667_v26  ;;  %v2849_v52 = vunpack.c.l.bf16 %v2839_v35  ;;  %v2912_v27 = vmul.f32 %v2881_v20, %v2848_v46  ;;  %v2901_v10 = vpop.permute.xlu0 %2900 }
 0x444   : > { %v2675_v18 = vpop.f32.mrf.mxu1  ;;  %v2851_v55 = vunpack.c.h.bf16 %v2839_v35  ;;  %v2914_v22 = vmul.f32 %v2886_v32, %v2850_v36 }
 0x445   : > { %v2832_v7 = vmul.bf16 1009007652, %v2824_v21  ;;  %v2825_v61 = vadd.bf16 %v3142_v59, %v2689_v23  ;;  %v2913_v3 = vmul.f32 %v2881_v20, %v2849_v52  ;;  %v2925_v6 = vadd.f32 %v2924_v40, %v2912_v27 }
 0x446   : > { %v2677_v16 = vpop.f32.mrf.mxu1  ;;  %v2915_v25 = vmul.f32 %v2886_v32, %v2851_v55 }
 0x447   : > { %v2840_v29 = vmax.bf16 %v2832_v7, %v2824_v21  ;;  %v2833_v45 = vmul.bf16 1009007652, %v2825_v61  ;;  %v2938_v56 = vadd.f32 %v2937_v5, %v2913_v3  ;;  %v2926_v4 = vadd.f32 %v2925_v6, %v2914_v22 }
 0x448   : > { %v2679_v30 = vpop.f32.mrf.mxu1 }
 0x449   : > { %v2852_v43 = vunpack.c.l.bf16 %v2840_v29  ;;  %v2841_v53 = vmax.bf16 %v2833_v45, %v2825_v61  ;;  %v2690_v58 = vpack.c.bf16 %v2679_v30, %v2675_v18  ;;  %v2854_v49 = vunpack.c.h.bf16 %v2840_v29  ;;  %v2954_v45 = vpop.permute.xlu0 %2953 }
 0x44a   : > { %v2681_v9 = vpop.f32.mrf.mxu1  ;;  %v2939_v24 = vadd.f32 %v2938_v56, %v2915_v25  ;;  %v2959_v30 = vrot.slane %v2954_v45, %v3599_v11 }
 0x44b   : > { %v2853_v50 = vunpack.c.l.bf16 %v2841_v53  ;;  %v2916_v1 = vmul.f32 %v2891_v19, %v2852_v43  ;;  %v2826_v13 = vadd.bf16 %v3143_v48, %v2690_v58  ;;  %v2691_v2 = vpack.c.bf16 %v2681_v9, %v2677_v16 }
 0x44c   : > { %v2855_v34 = vunpack.c.h.bf16 %v2841_v53  ;;  %v2918_v60 = vmul.f32 %v2896_v41, %v2854_v49 }
 0x44d   : > { %v2917_v37 = vmul.f32 %v2891_v19, %v2853_v50  ;;  %v2834_v38 = vmul.bf16 1009007652, %v2826_v13  ;;  %v2827_v39 = vadd.bf16 %v3143_v48, %v2691_v2  ;;  %v2927_v26 = vadd.f32 %v2926_v4, %v2916_v1 }
 0x44e   : > { %v2919_v51 = vmul.f32 %v2896_v41, %v2855_v34 }
 0x44f   : > { %v2842_v62 = vmax.bf16 %v2834_v38, %v2826_v13  ;;  %v2835_v57 = vmul.bf16 1009007652, %v2827_v39  ;;  %v2940_v8 = vadd.f32 %v2939_v24, %v2917_v37  ;;  %v2928_v44 = vadd.f32 %v2927_v26, %v2918_v60 }
 0x451   : > { %v2856_v14 = vunpack.c.l.bf16 %v2842_v62  ;;  %v2858_v33 = vunpack.c.h.bf16 %v2842_v62  ;;  %v2843_v59 = vmax.bf16 %v2835_v57, %v2827_v39  ;;  %v2941_v21 = vadd.f32 %v2940_v8, %v2919_v51 }
 0x453   : > { %v2920_v46 = vmul.f32 %v2901_v10, %v2856_v14  ;;  %v2857_v35 = vunpack.c.l.bf16 %v2843_v59  ;;  %v2859_v28 = vunpack.c.h.bf16 %v2843_v59  ;;  %v2922_v23 = vmul.f32 %v2906_v47, %v2858_v33 }
 0x455   : > { %v2929_v17 = vadd.f32 %v2928_v44, %v2920_v46  ;;  %v2921_v15 = vmul.f32 %v2901_v10, %v2857_v35  ;;  %v2923_v18 = vmul.f32 %v2906_v47, %v2859_v28 }
 0x457   : > { %v2930_v52 = vadd.f32 %v2929_v17, %v2922_v23  ;;  %v2942_v12 = vadd.f32 %v2941_v21, %v2921_v15 }
 0x459   : > { %v2931_v20 = vrot.slane %v2930_v52, 4  ;;  %v2943_v7 = vadd.f32 %v2942_v12, %v2923_v18 }
 0x45b   : > { %v2932_v61 = vadd.f32 %v2931_v20, %v2930_v52  ;;  %v2944_v63 = vrot.slane %v2943_v7, 4 }
 0x45d   : > { %v2933_v42 = vrot.slane %v2932_v61, 2  ;;  %v2945_v31 = vadd.f32 %v2944_v63, %v2943_v7 }
 0x45f   : > { %v2934_v27 = vadd.f32 %v2933_v42, %v2932_v61  ;;  %v2946_v16 = vrot.slane %v2945_v31, 2 }
 0x461   : > { %v2935_v36 = vrot.slane %v2934_v27, 1  ;;  %v2947_v29 = vadd.f32 %v2946_v16, %v2945_v31 }
 0x463   : > { %v2948_v40 = vrot.slane %v2947_v29, 1  ;;  %v2936_v3 = vadd.f32 %v2935_v36, %v2934_v27 }
 0x465   : > { %v2949_v32 = vadd.f32 %v2948_v40, %v2947_v29  ;;  %v2960_v55 = vadd.f32 %v2959_v30, %v2936_v3 }
 0x467   : > { %v2961_v43 = vadd.f32 %v2959_v30, %v2949_v32 }
 0x469   : > { %v2964_v53 = vcombine.low %v2960_v55, %v2961_v43 }
 0x46b   : > { %v2971_v58 = vrot.slane %v2964_v53, %v3583_v0 }
 0x46d   : > { %v2978_v48 = vrot.slane %v2971_v58, %v3583_v0 }
 0x46f   : > { %2984 = vst.msk [vmem:[%s380_s13] sm:$0x3] %vm2982_vm0, %v2978_v48 }
 0x470   : > { %3243 = shalt.err (!%p3240_p3)
}
 0x471   : > { %s3244_s0 = scalar_lea.hbm %s2998_s23, 32  ;;  %s3248_s13 = scalar_lea.hbm %s4181_s11, 64 }
 0x472   : > { %p3245_p4 = scmp.ne.s32.totalorder %s2998_s23, %s3244_s0  ;;  %p3249_p9 = scmp.lt.s32.totalorder %s2998_s23, %s4181_s11 }
 0x473   : > { %p3250_p10 = scmp.lt.s32.totalorder %s3248_s13, %s3244_s0 }
 0x474   : > { %p3246_p7 = pnand %p3245_p4, %p3397_p5 }
 0x475   : > { %p3251_p11 = por %p3250_p10, %p3249_p9 }
 0x476   : > { %p3247_p8 = pneg %p3246_p7 }
 0x478   : > { %p3252_p12 = pnand %p3251_p11, %p3247_p8 }
 0x47a   : > { %3255 = shalt.err (!%p3252_p12)
}
 0x47b   : > { %3150 = dma.vmem_to_hbm [thread:$0]  (%p3397_p5), %s3001_s14, 32, %s2998_s23, %s2986_s17  }
 0x47c PF: > { %p3156_p13 = scmp.ge.s32.totalorder %s3290_s22, 2  ;;  %s3012_s18 = sand.u32 1, %s3278_s19  }
 0x47d   : > { %s3013_s10 = scalar_lea.sflag [#allocation4], %s3012_s18 }
 0x47e   : > { %p3153_p0 = pnand %p3156_p13, %p3401_p6 }
 0x480   : > { %p3154_p1 = pneg %p3153_p0 }
 0x482   : > { %3273 = dma.done.wait (%p3154_p1), %s3013_s10, 32  }
 0x483   : > { %3275 = vsyncadd (%p3154_p1), %s3013_s10, 4294967264  ;;  %p23_p2 = scmp.ge.s32.totalorder %s3384_s24, 4   ;;  %s4186_s19 = smov %s3282_s20 }
 0x484   : > { %s4187_s20 = smov %s3286_s21  ;;  %s4188_s21 = smov %s3395_s27 }
 0x485   : > { %s4189_s22 = smov %s3384_s24  ;;  %25 = sbr.rel (!%p23_p2) target bundleno = 6 (0x6), region = 99 }
 0x48a   :  { %3018 = vsyncpa [#allocation4], 1 }
 0x48b   :  { %3020 = vsyncpa [#allocation4 + $0x1], 1 }

</bundles_post_ra>
